<compile_context>
chip_gen: v7x
topology: tpu7x:2x2x1
jax: 0.10.0
libtpu: 0.0.40
codegen_flags: <defaults>
</compile_context>

<pallas_src>
import jax
import jax.numpy as jnp
from jax.experimental import pallas as pl
from jax.experimental.pallas import tpu as pltpu

BN_EPS = 1e-5
HIDDEN = 128
BOTTLENECK = 8
LANES = 128              # every feature axis is zero-padded to this
NUM_LINEAR = 10          # 5 encoder + 5 decoder
NUM_BN = 9               # every linear except the last has BN + ReLU


def _layer_dims(input_dim):
    return [
        (input_dim, HIDDEN), (HIDDEN, HIDDEN), (HIDDEN, HIDDEN), (HIDDEN, HIDDEN),
        (HIDDEN, BOTTLENECK),
        (BOTTLENECK, HIDDEN), (HIDDEN, HIDDEN), (HIDDEN, HIDDEN), (HIDDEN, HIDDEN),
        (HIDDEN, input_dim),
    ]


def _autoencoder_kernel(x_ref, w_ref, gb_ref, out_ref):
    """Per grid step (one frame = one complete BN batch):
    x_ref:  (B, 128) lane-padded input (frame dim squeezed by BlockSpec).
    w_ref:  (10, 128, 128) zero-padded W^T per layer (VMEM-resident, constant
            block across the frame grid).
    gb_ref: (20, 128): row l = gamma_l (l<9), row 10+l = beta_l (l<9) /
            final decoder bias (l==9). Padded lanes are zero.
    out_ref: (B, 128) lane-padded output."""
    h = x_ref[...]                                   # (B, 128) f32, lane-dense
    inv_b = jnp.float32(1.0 / h.shape[0])
    for layer in range(NUM_LINEAR):
        # Linear. Pre-BN biases (layers 0..8) are dropped: cancelled by the
        # batch-mean subtraction of training-mode BN.
        h = jnp.dot(h, w_ref[layer], preferred_element_type=jnp.float32)
        if layer < NUM_BN:
            gamma = gb_ref[pl.ds(layer, 1), :]               # (1, 128) vld
            beta = gb_ref[pl.ds(NUM_LINEAR + layer, 1), :]   # (1, 128) vld
            # Training-mode BatchNorm1d (batch mean, biased variance), folded
            # into a single scale/shift, then ReLU. Two independent reductions
            # (sum, sum of squares) -> var = E[h^2] - mean^2 (clamped), rsqrt
            # issued immediately (EUP slot).
            s1 = jnp.sum(h, axis=0, keepdims=True)
            s2 = jnp.sum(h * h, axis=0, keepdims=True)
            mean = s1 * inv_b
            var = jnp.maximum(s2 * inv_b - mean * mean, 0.0)
            scale = gamma * jax.lax.rsqrt(var + BN_EPS)
            shift = beta - mean * scale
            h = jnp.maximum(h * scale + shift, 0.0)
        else:
            # Final decoder bias (no BN after it).
            h = h + gb_ref[pl.ds(NUM_LINEAR + layer, 1), :]
    out_ref[...] = h


def autoencoder_forward(x, w_slab, gb_slab, input_dim):
    """x: (F, B, ...) — F independent frames, each a complete BatchNorm batch
    of B samples. Each frame is flattened per-sample to (B, input_dim),
    mirroring the PyTorch x.view(B, -1). Returns (F, B, input_dim) float32."""
    f, b = x.shape[0], x.shape[1]
    x = x.reshape(f, b, -1).astype(jnp.float32)
    assert x.shape[2] == input_dim
    # Lane-pad the input to 128 features (padded W^T rows are zero -> exact).
    x_pad = jnp.zeros((f, b, LANES), jnp.float32).at[:, :, :input_dim].set(x)

    flops = 2 * f * b * NUM_LINEAR * LANES * LANES
    bytes_accessed = 4 * (x_pad.size + w_slab.size + gb_slab.size + f * b * LANES)

    grid_spec = pltpu.PrefetchScalarGridSpec(
        num_scalar_prefetch=0,
        grid=(f,),
        in_specs=[
            # per-frame activation tile
            pl.BlockSpec((None, b, LANES), lambda i: (i, 0, 0)),
            # weights: constant block index -> DMA'd once, VMEM-resident
            pl.BlockSpec((NUM_LINEAR, LANES, LANES), lambda i: (0, 0, 0)),
            pl.BlockSpec((2 * NUM_LINEAR, LANES), lambda i: (0, 0)),
        ],
        out_specs=pl.BlockSpec((None, b, LANES), lambda i: (i, 0, 0)),
    )

    out_pad = pl.pallas_call(
        _autoencoder_kernel,
        out_shape=jax.ShapeDtypeStruct((f, b, LANES), jnp.float32),
        grid_spec=grid_spec,
        compiler_params=pltpu.CompilerParams(
            # each grid step is an independent, complete BN batch
            dimension_semantics=("parallel",),
            vmem_limit_bytes=32 * 1024 * 1024),
        cost_estimate=pl.CostEstimate(
            flops=flops,
            transcendentals=f * NUM_BN * LANES,
            bytes_accessed=bytes_accessed),
    )(x_pad, w_slab, gb_slab)
    return out_pad[:, :, :input_dim]


def init_params(input_dim, key):
    """Deterministic synthetic parameters in PyTorch layout: per-layer dicts
    with W (out, in), b (out,), and gamma/beta for BN layers."""
    dims = _layer_dims(input_dim)
    layers = []
    keys = jax.random.split(key, 4 * NUM_LINEAR)
    k = 0
    for layer, (d_in, d_out) in enumerate(dims):
        w = jax.random.normal(keys[k], (d_out, d_in), jnp.float32) / jnp.sqrt(d_in)
        k += 1
        bias = 0.01 * jax.random.normal(keys[k], (d_out,), jnp.float32)
        k += 1
        p = {"w": w, "b": bias}
        if layer < NUM_BN:
            p["gamma"] = 1.0 + 0.1 * jax.random.normal(keys[k], (d_out,), jnp.float32)
            k += 1
            p["beta"] = 0.05 * jax.random.normal(keys[k], (d_out,), jnp.float32)
            k += 1
        layers.append(p)
    return layers


def pack_params(layers):
    """Pack all parameters into two lane-padded slabs for the kernel.

    w_slab : (10, 128, 128)  zero-padded W^T per layer.
    gb_slab: (20, 128)       row l = gamma_l, row 10+l = beta_l (l < 9);
                             row 19 = final decoder bias. Padded lanes are 0
                             so padded features stay exactly 0 through BN.
    Pre-BN biases (layers 0..8) are intentionally not shipped (cancelled by
    the batch-mean subtraction of training-mode BN).
    """
    w_slab = jnp.zeros((NUM_LINEAR, LANES, LANES), jnp.float32)
    gb_slab = jnp.zeros((2 * NUM_LINEAR, LANES), jnp.float32)
    for l, p in enumerate(layers):
        d_out, d_in = p["w"].shape
        w_slab = w_slab.at[l, :d_in, :d_out].set(p["w"].T)
        if l < NUM_BN:
            gb_slab = gb_slab.at[l, :d_out].set(p["gamma"])
            gb_slab = gb_slab.at[NUM_LINEAR + l, :d_out].set(p["beta"])
        else:
            gb_slab = gb_slab.at[NUM_LINEAR + l, :d_out].set(p["b"])
    return w_slab, gb_slab


def reference_forward_one_frame(x, layers):
    """Pure-JAX reference replicating the PyTorch forward for one batch
    (training-mode BN, all biases included)."""
    h = x.reshape(x.shape[0], -1).astype(jnp.float32)
    for l, p in enumerate(layers):
        h = h @ p["w"].T + p["b"]
        if l < NUM_BN:
            mean = jnp.mean(h, axis=0, keepdims=True)
            var = jnp.mean((h - mean) ** 2, axis=0, keepdims=True)
            h = (h - mean) / jnp.sqrt(var + BN_EPS) * p["gamma"] + p["beta"]
            h = jnp.maximum(h, 0.0)
    return h


if __name__ == "__main__":
    FRAMES = 4                     # independent batches amortizing one launch
    BATCH = 8                      # training-mode BN couples samples in batch
    C, H, W = 4, 4, 4              # flattened to input_dim = 64 by forward()
    INPUT_DIM = C * H * W

    key = jax.random.PRNGKey(0)
    k_x, k_p = jax.random.split(key)
    x = jax.random.normal(k_x, (FRAMES, BATCH, C, H, W), jnp.float32)
    layers = init_params(INPUT_DIM, k_p)
    w_slab, gb_slab = pack_params(layers)

    out = autoencoder_forward(x, w_slab, gb_slab, INPUT_DIM)
    out = jax.block_until_ready(out)

    ref = jnp.stack([reference_forward_one_frame(x[f], layers)
                     for f in range(FRAMES)])
    assert out.shape == (FRAMES, BATCH, INPUT_DIM)
    assert jnp.allclose(out, ref, atol=1e-3, rtol=1e-3), "mismatch vs reference"

    print("KERNEL_OK")
</pallas_src>

<mosaic_0001>
module attributes {stable_mosaic.version = 11 : i64} {
  func.func @_autoencoder_kernel(%arg0: i32, %arg1: memref<1x8x128xf32, #tpu.memory_space<vmem>>, %arg2: memref<10x128x128xf32, #tpu.memory_space<vmem>>, %arg3: memref<20x128xf32, #tpu.memory_space<vmem>>, %arg4: memref<1x8x128xf32, #tpu.memory_space<vmem>>) attributes {dimension_semantics = [#tpu.dimension_semantics<parallel>], iteration_bounds = array<i64: 4>, scalar_prefetch = 0 : i64, scratch_operands = 0 : i64, tpu.core_type = #tpu.core_type<tc>, window_params = [{transform_indices = @transform_0, window_bounds = array<i64: 1, 8, 128>}, {pipeline_mode = #tpu.pipeline_mode<synchronous>, transform_indices = @transform_1, window_bounds = array<i64: 10, 128, 128>}, {pipeline_mode = #tpu.pipeline_mode<synchronous>, transform_indices = @transform_2, window_bounds = array<i64: 20, 128>}, {transform_indices = @transform_3, window_bounds = array<i64: 1, 8, 128>}]} {
    %c0 = arith.constant 0 : index
    %c0_0 = arith.constant 0 : index
    %c0_1 = arith.constant 0 : index
    %0 = vector.load %arg1[%c0, %c0_0, %c0_1] : memref<1x8x128xf32, #tpu.memory_space<vmem>>, vector<1x8x128xf32>
    %1 = vector.shape_cast %0 : vector<1x8x128xf32> to vector<8x128xf32>
    %c0_2 = arith.constant 0 : index
    %c0_3 = arith.constant 0 : index
    %c0_4 = arith.constant 0 : index
    %2 = vector.load %arg2[%c0_2, %c0_3, %c0_4] : memref<10x128x128xf32, #tpu.memory_space<vmem>>, vector<1x128x128xf32>
    %3 = vector.shape_cast %2 : vector<1x128x128xf32> to vector<128x128xf32>
    %cst = arith.constant dense<0.000000e+00> : vector<8x128xf32>
    %4 = tpu.matmul %1, %3, %cst {dimension_numbers = #tpu.dot_dimension_numbers<[1], [0], [0], [1], [0, 0, 1, 1], [], []>} : vector<8x128xf32>, vector<128x128xf32>, vector<8x128xf32> -> vector<8x128xf32>
    %c0_5 = arith.constant 0 : index
    %c0_6 = arith.constant 0 : index
    %5 = vector.load %arg3[%c0_5, %c0_6] : memref<20x128xf32, #tpu.memory_space<vmem>>, vector<1x128xf32>
    %c10 = arith.constant 10 : index
    %c0_7 = arith.constant 0 : index
    %6 = vector.load %arg3[%c10, %c0_7] : memref<20x128xf32, #tpu.memory_space<vmem>>, vector<1x128xf32>
    %cst_8 = arith.constant dense<0.000000e+00> : vector<128xf32>
    %7 = vector.multi_reduction <add>, %4, %cst_8 [0] : vector<8x128xf32> to vector<128xf32>
    %8 = vector.shape_cast %7 : vector<128xf32> to vector<1x128xf32>
    %9 = arith.mulf %4, %4 : vector<8x128xf32>
    %cst_9 = arith.constant dense<0.000000e+00> : vector<128xf32>
    %10 = vector.multi_reduction <add>, %9, %cst_9 [0] : vector<8x128xf32> to vector<128xf32>
    %11 = vector.shape_cast %10 : vector<128xf32> to vector<1x128xf32>
    %cst_10 = arith.constant 1.250000e-01 : f32
    %12 = vector.broadcast %cst_10 : f32 to vector<1x128xf32>
    %13 = arith.mulf %8, %12 : vector<1x128xf32>
    %cst_11 = arith.constant 1.250000e-01 : f32
    %14 = vector.broadcast %cst_11 : f32 to vector<1x128xf32>
    %15 = arith.mulf %11, %14 : vector<1x128xf32>
    %16 = arith.mulf %13, %13 : vector<1x128xf32>
    %17 = arith.subf %15, %16 : vector<1x128xf32>
    %cst_12 = arith.constant 0.000000e+00 : f32
    %18 = vector.broadcast %cst_12 : f32 to vector<1x128xf32>
    %19 = arith.maximumf %17, %18 : vector<1x128xf32>
    %cst_13 = arith.constant 9.99999974E-6 : f32
    %20 = vector.broadcast %cst_13 : f32 to vector<1x128xf32>
    %21 = arith.addf %19, %20 : vector<1x128xf32>
    %22 = math.rsqrt %21 : vector<1x128xf32>
    %23 = arith.mulf %5, %22 : vector<1x128xf32>
    %24 = arith.mulf %13, %23 : vector<1x128xf32>
    %25 = arith.subf %6, %24 : vector<1x128xf32>
    %26 = vector.broadcast %23 : vector<1x128xf32> to vector<8x128xf32>
    %27 = arith.mulf %4, %26 : vector<8x128xf32>
    %28 = vector.broadcast %25 : vector<1x128xf32> to vector<8x128xf32>
    %29 = arith.addf %27, %28 : vector<8x128xf32>
    %cst_14 = arith.constant 0.000000e+00 : f32
    %30 = vector.broadcast %cst_14 : f32 to vector<8x128xf32>
    %31 = arith.maximumf %29, %30 : vector<8x128xf32>
    %c1 = arith.constant 1 : index
    %c0_15 = arith.constant 0 : index
    %c0_16 = arith.constant 0 : index
    %32 = vector.load %arg2[%c1, %c0_15, %c0_16] : memref<10x128x128xf32, #tpu.memory_space<vmem>>, vector<1x128x128xf32>
    %33 = vector.shape_cast %32 : vector<1x128x128xf32> to vector<128x128xf32>
    %cst_17 = arith.constant dense<0.000000e+00> : vector<8x128xf32>
    %34 = tpu.matmul %31, %33, %cst_17 {dimension_numbers = #tpu.dot_dimension_numbers<[1], [0], [0], [1], [0, 0, 1, 1], [], []>} : vector<8x128xf32>, vector<128x128xf32>, vector<8x128xf32> -> vector<8x128xf32>
    %c1_18 = arith.constant 1 : index
    %c0_19 = arith.constant 0 : index
    %35 = vector.load %arg3[%c1_18, %c0_19] : memref<20x128xf32, #tpu.memory_space<vmem>>, vector<1x128xf32>
    %c11 = arith.constant 11 : index
    %c0_20 = arith.constant 0 : index
    %36 = vector.load %arg3[%c11, %c0_20] : memref<20x128xf32, #tpu.memory_space<vmem>>, vector<1x128xf32>
    %cst_21 = arith.constant dense<0.000000e+00> : vector<128xf32>
    %37 = vector.multi_reduction <add>, %34, %cst_21 [0] : vector<8x128xf32> to vector<128xf32>
    %38 = vector.shape_cast %37 : vector<128xf32> to vector<1x128xf32>
    %39 = arith.mulf %34, %34 : vector<8x128xf32>
    %cst_22 = arith.constant dense<0.000000e+00> : vector<128xf32>
    %40 = vector.multi_reduction <add>, %39, %cst_22 [0] : vector<8x128xf32> to vector<128xf32>
    %41 = vector.shape_cast %40 : vector<128xf32> to vector<1x128xf32>
    %cst_23 = arith.constant 1.250000e-01 : f32
    %42 = vector.broadcast %cst_23 : f32 to vector<1x128xf32>
    %43 = arith.mulf %38, %42 : vector<1x128xf32>
    %cst_24 = arith.constant 1.250000e-01 : f32
    %44 = vector.broadcast %cst_24 : f32 to vector<1x128xf32>
    %45 = arith.mulf %41, %44 : vector<1x128xf32>
    %46 = arith.mulf %43, %43 : vector<1x128xf32>
    %47 = arith.subf %45, %46 : vector<1x128xf32>
    %cst_25 = arith.constant 0.000000e+00 : f32
    %48 = vector.broadcast %cst_25 : f32 to vector<1x128xf32>
    %49 = arith.maximumf %47, %48 : vector<1x128xf32>
    %cst_26 = arith.constant 9.99999974E-6 : f32
    %50 = vector.broadcast %cst_26 : f32 to vector<1x128xf32>
    %51 = arith.addf %49, %50 : vector<1x128xf32>
    %52 = math.rsqrt %51 : vector<1x128xf32>
    %53 = arith.mulf %35, %52 : vector<1x128xf32>
    %54 = arith.mulf %43, %53 : vector<1x128xf32>
    %55 = arith.subf %36, %54 : vector<1x128xf32>
    %56 = vector.broadcast %53 : vector<1x128xf32> to vector<8x128xf32>
    %57 = arith.mulf %34, %56 : vector<8x128xf32>
    %58 = vector.broadcast %55 : vector<1x128xf32> to vector<8x128xf32>
    %59 = arith.addf %57, %58 : vector<8x128xf32>
    %cst_27 = arith.constant 0.000000e+00 : f32
    %60 = vector.broadcast %cst_27 : f32 to vector<8x128xf32>
    %61 = arith.maximumf %59, %60 : vector<8x128xf32>
    %c2 = arith.constant 2 : index
    %c0_28 = arith.constant 0 : index
    %c0_29 = arith.constant 0 : index
    %62 = vector.load %arg2[%c2, %c0_28, %c0_29] : memref<10x128x128xf32, #tpu.memory_space<vmem>>, vector<1x128x128xf32>
    %63 = vector.shape_cast %62 : vector<1x128x128xf32> to vector<128x128xf32>
    %cst_30 = arith.constant dense<0.000000e+00> : vector<8x128xf32>
    %64 = tpu.matmul %61, %63, %cst_30 {dimension_numbers = #tpu.dot_dimension_numbers<[1], [0], [0], [1], [0, 0, 1, 1], [], []>} : vector<8x128xf32>, vector<128x128xf32>, vector<8x128xf32> -> vector<8x128xf32>
    %c2_31 = arith.constant 2 : index
    %c0_32 = arith.constant 0 : index
    %65 = vector.load %arg3[%c2_31, %c0_32] : memref<20x128xf32, #tpu.memory_space<vmem>>, vector<1x128xf32>
    %c12 = arith.constant 12 : index
    %c0_33 = arith.constant 0 : index
    %66 = vector.load %arg3[%c12, %c0_33] : memref<20x128xf32, #tpu.memory_space<vmem>>, vector<1x128xf32>
    %cst_34 = arith.constant dense<0.000000e+00> : vector<128xf32>
    %67 = vector.multi_reduction <add>, %64, %cst_34 [0] : vector<8x128xf32> to vector<128xf32>
    %68 = vector.shape_cast %67 : vector<128xf32> to vector<1x128xf32>
    %69 = arith.mulf %64, %64 : vector<8x128xf32>
    %cst_35 = arith.constant dense<0.000000e+00> : vector<128xf32>
    %70 = vector.multi_reduction <add>, %69, %cst_35 [0] : vector<8x128xf32> to vector<128xf32>
    %71 = vector.shape_cast %70 : vector<128xf32> to vector<1x128xf32>
    %cst_36 = arith.constant 1.250000e-01 : f32
    %72 = vector.broadcast %cst_36 : f32 to vector<1x128xf32>
    %73 = arith.mulf %68, %72 : vector<1x128xf32>
    %cst_37 = arith.constant 1.250000e-01 : f32
    %74 = vector.broadcast %cst_37 : f32 to vector<1x128xf32>
    %75 = arith.mulf %71, %74 : vector<1x128xf32>
    %76 = arith.mulf %73, %73 : vector<1x128xf32>
    %77 = arith.subf %75, %76 : vector<1x128xf32>
    %cst_38 = arith.constant 0.000000e+00 : f32
    %78 = vector.broadcast %cst_38 : f32 to vector<1x128xf32>
    %79 = arith.maximumf %77, %78 : vector<1x128xf32>
    %cst_39 = arith.constant 9.99999974E-6 : f32
    %80 = vector.broadcast %cst_39 : f32 to vector<1x128xf32>
    %81 = arith.addf %79, %80 : vector<1x128xf32>
    %82 = math.rsqrt %81 : vector<1x128xf32>
    %83 = arith.mulf %65, %82 : vector<1x128xf32>
    %84 = arith.mulf %73, %83 : vector<1x128xf32>
    %85 = arith.subf %66, %84 : vector<1x128xf32>
    %86 = vector.broadcast %83 : vector<1x128xf32> to vector<8x128xf32>
    %87 = arith.mulf %64, %86 : vector<8x128xf32>
    %88 = vector.broadcast %85 : vector<1x128xf32> to vector<8x128xf32>
    %89 = arith.addf %87, %88 : vector<8x128xf32>
    %cst_40 = arith.constant 0.000000e+00 : f32
    %90 = vector.broadcast %cst_40 : f32 to vector<8x128xf32>
    %91 = arith.maximumf %89, %90 : vector<8x128xf32>
    %c3 = arith.constant 3 : index
    %c0_41 = arith.constant 0 : index
    %c0_42 = arith.constant 0 : index
    %92 = vector.load %arg2[%c3, %c0_41, %c0_42] : memref<10x128x128xf32, #tpu.memory_space<vmem>>, vector<1x128x128xf32>
    %93 = vector.shape_cast %92 : vector<1x128x128xf32> to vector<128x128xf32>
    %cst_43 = arith.constant dense<0.000000e+00> : vector<8x128xf32>
    %94 = tpu.matmul %91, %93, %cst_43 {dimension_numbers = #tpu.dot_dimension_numbers<[1], [0], [0], [1], [0, 0, 1, 1], [], []>} : vector<8x128xf32>, vector<128x128xf32>, vector<8x128xf32> -> vector<8x128xf32>
    %c3_44 = arith.constant 3 : index
    %c0_45 = arith.constant 0 : index
    %95 = vector.load %arg3[%c3_44, %c0_45] : memref<20x128xf32, #tpu.memory_space<vmem>>, vector<1x128xf32>
    %c13 = arith.constant 13 : index
    %c0_46 = arith.constant 0 : index
    %96 = vector.load %arg3[%c13, %c0_46] : memref<20x128xf32, #tpu.memory_space<vmem>>, vector<1x128xf32>
    %cst_47 = arith.constant dense<0.000000e+00> : vector<128xf32>
    %97 = vector.multi_reduction <add>, %94, %cst_47 [0] : vector<8x128xf32> to vector<128xf32>
    %98 = vector.shape_cast %97 : vector<128xf32> to vector<1x128xf32>
    %99 = arith.mulf %94, %94 : vector<8x128xf32>
    %cst_48 = arith.constant dense<0.000000e+00> : vector<128xf32>
    %100 = vector.multi_reduction <add>, %99, %cst_48 [0] : vector<8x128xf32> to vector<128xf32>
    %101 = vector.shape_cast %100 : vector<128xf32> to vector<1x128xf32>
    %cst_49 = arith.constant 1.250000e-01 : f32
    %102 = vector.broadcast %cst_49 : f32 to vector<1x128xf32>
    %103 = arith.mulf %98, %102 : vector<1x128xf32>
    %cst_50 = arith.constant 1.250000e-01 : f32
    %104 = vector.broadcast %cst_50 : f32 to vector<1x128xf32>
    %105 = arith.mulf %101, %104 : vector<1x128xf32>
    %106 = arith.mulf %103, %103 : vector<1x128xf32>
    %107 = arith.subf %105, %106 : vector<1x128xf32>
    %cst_51 = arith.constant 0.000000e+00 : f32
    %108 = vector.broadcast %cst_51 : f32 to vector<1x128xf32>
    %109 = arith.maximumf %107, %108 : vector<1x128xf32>
    %cst_52 = arith.constant 9.99999974E-6 : f32
    %110 = vector.broadcast %cst_52 : f32 to vector<1x128xf32>
    %111 = arith.addf %109, %110 : vector<1x128xf32>
    %112 = math.rsqrt %111 : vector<1x128xf32>
    %113 = arith.mulf %95, %112 : vector<1x128xf32>
    %114 = arith.mulf %103, %113 : vector<1x128xf32>
    %115 = arith.subf %96, %114 : vector<1x128xf32>
    %116 = vector.broadcast %113 : vector<1x128xf32> to vector<8x128xf32>
    %117 = arith.mulf %94, %116 : vector<8x128xf32>
    %118 = vector.broadcast %115 : vector<1x128xf32> to vector<8x128xf32>
    %119 = arith.addf %117, %118 : vector<8x128xf32>
    %cst_53 = arith.constant 0.000000e+00 : f32
    %120 = vector.broadcast %cst_53 : f32 to vector<8x128xf32>
    %121 = arith.maximumf %119, %120 : vector<8x128xf32>
    %c4 = arith.constant 4 : index
    %c0_54 = arith.constant 0 : index
    %c0_55 = arith.constant 0 : index
    %122 = vector.load %arg2[%c4, %c0_54, %c0_55] : memref<10x128x128xf32, #tpu.memory_space<vmem>>, vector<1x128x128xf32>
    %123 = vector.shape_cast %122 : vector<1x128x128xf32> to vector<128x128xf32>
    %cst_56 = arith.constant dense<0.000000e+00> : vector<8x128xf32>
    %124 = tpu.matmul %121, %123, %cst_56 {dimension_numbers = #tpu.dot_dimension_numbers<[1], [0], [0], [1], [0, 0, 1, 1], [], []>} : vector<8x128xf32>, vector<128x128xf32>, vector<8x128xf32> -> vector<8x128xf32>
    %c4_57 = arith.constant 4 : index
    %c0_58 = arith.constant 0 : index
    %125 = vector.load %arg3[%c4_57, %c0_58] : memref<20x128xf32, #tpu.memory_space<vmem>>, vector<1x128xf32>
    %c14 = arith.constant 14 : index
    %c0_59 = arith.constant 0 : index
    %126 = vector.load %arg3[%c14, %c0_59] : memref<20x128xf32, #tpu.memory_space<vmem>>, vector<1x128xf32>
    %cst_60 = arith.constant dense<0.000000e+00> : vector<128xf32>
    %127 = vector.multi_reduction <add>, %124, %cst_60 [0] : vector<8x128xf32> to vector<128xf32>
    %128 = vector.shape_cast %127 : vector<128xf32> to vector<1x128xf32>
    %129 = arith.mulf %124, %124 : vector<8x128xf32>
    %cst_61 = arith.constant dense<0.000000e+00> : vector<128xf32>
    %130 = vector.multi_reduction <add>, %129, %cst_61 [0] : vector<8x128xf32> to vector<128xf32>
    %131 = vector.shape_cast %130 : vector<128xf32> to vector<1x128xf32>
    %cst_62 = arith.constant 1.250000e-01 : f32
    %132 = vector.broadcast %cst_62 : f32 to vector<1x128xf32>
    %133 = arith.mulf %128, %132 : vector<1x128xf32>
    %cst_63 = arith.constant 1.250000e-01 : f32
    %134 = vector.broadcast %cst_63 : f32 to vector<1x128xf32>
    %135 = arith.mulf %131, %134 : vector<1x128xf32>
    %136 = arith.mulf %133, %133 : vector<1x128xf32>
    %137 = arith.subf %135, %136 : vector<1x128xf32>
    %cst_64 = arith.constant 0.000000e+00 : f32
    %138 = vector.broadcast %cst_64 : f32 to vector<1x128xf32>
    %139 = arith.maximumf %137, %138 : vector<1x128xf32>
    %cst_65 = arith.constant 9.99999974E-6 : f32
    %140 = vector.broadcast %cst_65 : f32 to vector<1x128xf32>
    %141 = arith.addf %139, %140 : vector<1x128xf32>
    %142 = math.rsqrt %141 : vector<1x128xf32>
    %143 = arith.mulf %125, %142 : vector<1x128xf32>
    %144 = arith.mulf %133, %143 : vector<1x128xf32>
    %145 = arith.subf %126, %144 : vector<1x128xf32>
    %146 = vector.broadcast %143 : vector<1x128xf32> to vector<8x128xf32>
    %147 = arith.mulf %124, %146 : vector<8x128xf32>
    %148 = vector.broadcast %145 : vector<1x128xf32> to vector<8x128xf32>
    %149 = arith.addf %147, %148 : vector<8x128xf32>
    %cst_66 = arith.constant 0.000000e+00 : f32
    %150 = vector.broadcast %cst_66 : f32 to vector<8x128xf32>
    %151 = arith.maximumf %149, %150 : vector<8x128xf32>
    %c5 = arith.constant 5 : index
    %c0_67 = arith.constant 0 : index
    %c0_68 = arith.constant 0 : index
    %152 = vector.load %arg2[%c5, %c0_67, %c0_68] : memref<10x128x128xf32, #tpu.memory_space<vmem>>, vector<1x128x128xf32>
    %153 = vector.shape_cast %152 : vector<1x128x128xf32> to vector<128x128xf32>
    %cst_69 = arith.constant dense<0.000000e+00> : vector<8x128xf32>
    %154 = tpu.matmul %151, %153, %cst_69 {dimension_numbers = #tpu.dot_dimension_numbers<[1], [0], [0], [1], [0, 0, 1, 1], [], []>} : vector<8x128xf32>, vector<128x128xf32>, vector<8x128xf32> -> vector<8x128xf32>
    %c5_70 = arith.constant 5 : index
    %c0_71 = arith.constant 0 : index
    %155 = vector.load %arg3[%c5_70, %c0_71] : memref<20x128xf32, #tpu.memory_space<vmem>>, vector<1x128xf32>
    %c15 = arith.constant 15 : index
    %c0_72 = arith.constant 0 : index
    %156 = vector.load %arg3[%c15, %c0_72] : memref<20x128xf32, #tpu.memory_space<vmem>>, vector<1x128xf32>
    %cst_73 = arith.constant dense<0.000000e+00> : vector<128xf32>
    %157 = vector.multi_reduction <add>, %154, %cst_73 [0] : vector<8x128xf32> to vector<128xf32>
    %158 = vector.shape_cast %157 : vector<128xf32> to vector<1x128xf32>
    %159 = arith.mulf %154, %154 : vector<8x128xf32>
    %cst_74 = arith.constant dense<0.000000e+00> : vector<128xf32>
    %160 = vector.multi_reduction <add>, %159, %cst_74 [0] : vector<8x128xf32> to vector<128xf32>
    %161 = vector.shape_cast %160 : vector<128xf32> to vector<1x128xf32>
    %cst_75 = arith.constant 1.250000e-01 : f32
    %162 = vector.broadcast %cst_75 : f32 to vector<1x128xf32>
    %163 = arith.mulf %158, %162 : vector<1x128xf32>
    %cst_76 = arith.constant 1.250000e-01 : f32
    %164 = vector.broadcast %cst_76 : f32 to vector<1x128xf32>
    %165 = arith.mulf %161, %164 : vector<1x128xf32>
    %166 = arith.mulf %163, %163 : vector<1x128xf32>
    %167 = arith.subf %165, %166 : vector<1x128xf32>
    %cst_77 = arith.constant 0.000000e+00 : f32
    %168 = vector.broadcast %cst_77 : f32 to vector<1x128xf32>
    %169 = arith.maximumf %167, %168 : vector<1x128xf32>
    %cst_78 = arith.constant 9.99999974E-6 : f32
    %170 = vector.broadcast %cst_78 : f32 to vector<1x128xf32>
    %171 = arith.addf %169, %170 : vector<1x128xf32>
    %172 = math.rsqrt %171 : vector<1x128xf32>
    %173 = arith.mulf %155, %172 : vector<1x128xf32>
    %174 = arith.mulf %163, %173 : vector<1x128xf32>
    %175 = arith.subf %156, %174 : vector<1x128xf32>
    %176 = vector.broadcast %173 : vector<1x128xf32> to vector<8x128xf32>
    %177 = arith.mulf %154, %176 : vector<8x128xf32>
    %178 = vector.broadcast %175 : vector<1x128xf32> to vector<8x128xf32>
    %179 = arith.addf %177, %178 : vector<8x128xf32>
    %cst_79 = arith.constant 0.000000e+00 : f32
    %180 = vector.broadcast %cst_79 : f32 to vector<8x128xf32>
    %181 = arith.maximumf %179, %180 : vector<8x128xf32>
    %c6 = arith.constant 6 : index
    %c0_80 = arith.constant 0 : index
    %c0_81 = arith.constant 0 : index
    %182 = vector.load %arg2[%c6, %c0_80, %c0_81] : memref<10x128x128xf32, #tpu.memory_space<vmem>>, vector<1x128x128xf32>
    %183 = vector.shape_cast %182 : vector<1x128x128xf32> to vector<128x128xf32>
    %cst_82 = arith.constant dense<0.000000e+00> : vector<8x128xf32>
    %184 = tpu.matmul %181, %183, %cst_82 {dimension_numbers = #tpu.dot_dimension_numbers<[1], [0], [0], [1], [0, 0, 1, 1], [], []>} : vector<8x128xf32>, vector<128x128xf32>, vector<8x128xf32> -> vector<8x128xf32>
    %c6_83 = arith.constant 6 : index
    %c0_84 = arith.constant 0 : index
    %185 = vector.load %arg3[%c6_83, %c0_84] : memref<20x128xf32, #tpu.memory_space<vmem>>, vector<1x128xf32>
    %c16 = arith.constant 16 : index
    %c0_85 = arith.constant 0 : index
    %186 = vector.load %arg3[%c16, %c0_85] : memref<20x128xf32, #tpu.memory_space<vmem>>, vector<1x128xf32>
    %cst_86 = arith.constant dense<0.000000e+00> : vector<128xf32>
    %187 = vector.multi_reduction <add>, %184, %cst_86 [0] : vector<8x128xf32> to vector<128xf32>
    %188 = vector.shape_cast %187 : vector<128xf32> to vector<1x128xf32>
    %189 = arith.mulf %184, %184 : vector<8x128xf32>
    %cst_87 = arith.constant dense<0.000000e+00> : vector<128xf32>
    %190 = vector.multi_reduction <add>, %189, %cst_87 [0] : vector<8x128xf32> to vector<128xf32>
    %191 = vector.shape_cast %190 : vector<128xf32> to vector<1x128xf32>
    %cst_88 = arith.constant 1.250000e-01 : f32
    %192 = vector.broadcast %cst_88 : f32 to vector<1x128xf32>
    %193 = arith.mulf %188, %192 : vector<1x128xf32>
    %cst_89 = arith.constant 1.250000e-01 : f32
    %194 = vector.broadcast %cst_89 : f32 to vector<1x128xf32>
    %195 = arith.mulf %191, %194 : vector<1x128xf32>
    %196 = arith.mulf %193, %193 : vector<1x128xf32>
    %197 = arith.subf %195, %196 : vector<1x128xf32>
    %cst_90 = arith.constant 0.000000e+00 : f32
    %198 = vector.broadcast %cst_90 : f32 to vector<1x128xf32>
    %199 = arith.maximumf %197, %198 : vector<1x128xf32>
    %cst_91 = arith.constant 9.99999974E-6 : f32
    %200 = vector.broadcast %cst_91 : f32 to vector<1x128xf32>
    %201 = arith.addf %199, %200 : vector<1x128xf32>
    %202 = math.rsqrt %201 : vector<1x128xf32>
    %203 = arith.mulf %185, %202 : vector<1x128xf32>
    %204 = arith.mulf %193, %203 : vector<1x128xf32>
    %205 = arith.subf %186, %204 : vector<1x128xf32>
    %206 = vector.broadcast %203 : vector<1x128xf32> to vector<8x128xf32>
    %207 = arith.mulf %184, %206 : vector<8x128xf32>
    %208 = vector.broadcast %205 : vector<1x128xf32> to vector<8x128xf32>
    %209 = arith.addf %207, %208 : vector<8x128xf32>
    %cst_92 = arith.constant 0.000000e+00 : f32
    %210 = vector.broadcast %cst_92 : f32 to vector<8x128xf32>
    %211 = arith.maximumf %209, %210 : vector<8x128xf32>
    %c7 = arith.constant 7 : index
    %c0_93 = arith.constant 0 : index
    %c0_94 = arith.constant 0 : index
    %212 = vector.load %arg2[%c7, %c0_93, %c0_94] : memref<10x128x128xf32, #tpu.memory_space<vmem>>, vector<1x128x128xf32>
    %213 = vector.shape_cast %212 : vector<1x128x128xf32> to vector<128x128xf32>
    %cst_95 = arith.constant dense<0.000000e+00> : vector<8x128xf32>
    %214 = tpu.matmul %211, %213, %cst_95 {dimension_numbers = #tpu.dot_dimension_numbers<[1], [0], [0], [1], [0, 0, 1, 1], [], []>} : vector<8x128xf32>, vector<128x128xf32>, vector<8x128xf32> -> vector<8x128xf32>
    %c7_96 = arith.constant 7 : index
    %c0_97 = arith.constant 0 : index
    %215 = vector.load %arg3[%c7_96, %c0_97] : memref<20x128xf32, #tpu.memory_space<vmem>>, vector<1x128xf32>
    %c17 = arith.constant 17 : index
    %c0_98 = arith.constant 0 : index
    %216 = vector.load %arg3[%c17, %c0_98] : memref<20x128xf32, #tpu.memory_space<vmem>>, vector<1x128xf32>
    %cst_99 = arith.constant dense<0.000000e+00> : vector<128xf32>
    %217 = vector.multi_reduction <add>, %214, %cst_99 [0] : vector<8x128xf32> to vector<128xf32>
    %218 = vector.shape_cast %217 : vector<128xf32> to vector<1x128xf32>
    %219 = arith.mulf %214, %214 : vector<8x128xf32>
    %cst_100 = arith.constant dense<0.000000e+00> : vector<128xf32>
    %220 = vector.multi_reduction <add>, %219, %cst_100 [0] : vector<8x128xf32> to vector<128xf32>
    %221 = vector.shape_cast %220 : vector<128xf32> to vector<1x128xf32>
    %cst_101 = arith.constant 1.250000e-01 : f32
    %222 = vector.broadcast %cst_101 : f32 to vector<1x128xf32>
    %223 = arith.mulf %218, %222 : vector<1x128xf32>
    %cst_102 = arith.constant 1.250000e-01 : f32
    %224 = vector.broadcast %cst_102 : f32 to vector<1x128xf32>
    %225 = arith.mulf %221, %224 : vector<1x128xf32>
    %226 = arith.mulf %223, %223 : vector<1x128xf32>
    %227 = arith.subf %225, %226 : vector<1x128xf32>
    %cst_103 = arith.constant 0.000000e+00 : f32
    %228 = vector.broadcast %cst_103 : f32 to vector<1x128xf32>
    %229 = arith.maximumf %227, %228 : vector<1x128xf32>
    %cst_104 = arith.constant 9.99999974E-6 : f32
    %230 = vector.broadcast %cst_104 : f32 to vector<1x128xf32>
    %231 = arith.addf %229, %230 : vector<1x128xf32>
    %232 = math.rsqrt %231 : vector<1x128xf32>
    %233 = arith.mulf %215, %232 : vector<1x128xf32>
    %234 = arith.mulf %223, %233 : vector<1x128xf32>
    %235 = arith.subf %216, %234 : vector<1x128xf32>
    %236 = vector.broadcast %233 : vector<1x128xf32> to vector<8x128xf32>
    %237 = arith.mulf %214, %236 : vector<8x128xf32>
    %238 = vector.broadcast %235 : vector<1x128xf32> to vector<8x128xf32>
    %239 = arith.addf %237, %238 : vector<8x128xf32>
    %cst_105 = arith.constant 0.000000e+00 : f32
    %240 = vector.broadcast %cst_105 : f32 to vector<8x128xf32>
    %241 = arith.maximumf %239, %240 : vector<8x128xf32>
    %c8 = arith.constant 8 : index
    %c0_106 = arith.constant 0 : index
    %c0_107 = arith.constant 0 : index
    %242 = vector.load %arg2[%c8, %c0_106, %c0_107] : memref<10x128x128xf32, #tpu.memory_space<vmem>>, vector<1x128x128xf32>
    %243 = vector.shape_cast %242 : vector<1x128x128xf32> to vector<128x128xf32>
    %cst_108 = arith.constant dense<0.000000e+00> : vector<8x128xf32>
    %244 = tpu.matmul %241, %243, %cst_108 {dimension_numbers = #tpu.dot_dimension_numbers<[1], [0], [0], [1], [0, 0, 1, 1], [], []>} : vector<8x128xf32>, vector<128x128xf32>, vector<8x128xf32> -> vector<8x128xf32>
    %c8_109 = arith.constant 8 : index
    %c0_110 = arith.constant 0 : index
    %245 = vector.load %arg3[%c8_109, %c0_110] : memref<20x128xf32, #tpu.memory_space<vmem>>, vector<1x128xf32>
    %c18 = arith.constant 18 : index
    %c0_111 = arith.constant 0 : index
    %246 = vector.load %arg3[%c18, %c0_111] : memref<20x128xf32, #tpu.memory_space<vmem>>, vector<1x128xf32>
    %cst_112 = arith.constant dense<0.000000e+00> : vector<128xf32>
    %247 = vector.multi_reduction <add>, %244, %cst_112 [0] : vector<8x128xf32> to vector<128xf32>
    %248 = vector.shape_cast %247 : vector<128xf32> to vector<1x128xf32>
    %249 = arith.mulf %244, %244 : vector<8x128xf32>
    %cst_113 = arith.constant dense<0.000000e+00> : vector<128xf32>
    %250 = vector.multi_reduction <add>, %249, %cst_113 [0] : vector<8x128xf32> to vector<128xf32>
    %251 = vector.shape_cast %250 : vector<128xf32> to vector<1x128xf32>
    %cst_114 = arith.constant 1.250000e-01 : f32
    %252 = vector.broadcast %cst_114 : f32 to vector<1x128xf32>
    %253 = arith.mulf %248, %252 : vector<1x128xf32>
    %cst_115 = arith.constant 1.250000e-01 : f32
    %254 = vector.broadcast %cst_115 : f32 to vector<1x128xf32>
    %255 = arith.mulf %251, %254 : vector<1x128xf32>
    %256 = arith.mulf %253, %253 : vector<1x128xf32>
    %257 = arith.subf %255, %256 : vector<1x128xf32>
    %cst_116 = arith.constant 0.000000e+00 : f32
    %258 = vector.broadcast %cst_116 : f32 to vector<1x128xf32>
    %259 = arith.maximumf %257, %258 : vector<1x128xf32>
    %cst_117 = arith.constant 9.99999974E-6 : f32
    %260 = vector.broadcast %cst_117 : f32 to vector<1x128xf32>
    %261 = arith.addf %259, %260 : vector<1x128xf32>
    %262 = math.rsqrt %261 : vector<1x128xf32>
    %263 = arith.mulf %245, %262 : vector<1x128xf32>
    %264 = arith.mulf %253, %263 : vector<1x128xf32>
    %265 = arith.subf %246, %264 : vector<1x128xf32>
    %266 = vector.broadcast %263 : vector<1x128xf32> to vector<8x128xf32>
    %267 = arith.mulf %244, %266 : vector<8x128xf32>
    %268 = vector.broadcast %265 : vector<1x128xf32> to vector<8x128xf32>
    %269 = arith.addf %267, %268 : vector<8x128xf32>
    %cst_118 = arith.constant 0.000000e+00 : f32
    %270 = vector.broadcast %cst_118 : f32 to vector<8x128xf32>
    %271 = arith.maximumf %269, %270 : vector<8x128xf32>
    %c9 = arith.constant 9 : index
    %c0_119 = arith.constant 0 : index
    %c0_120 = arith.constant 0 : index
    %272 = vector.load %arg2[%c9, %c0_119, %c0_120] : memref<10x128x128xf32, #tpu.memory_space<vmem>>, vector<1x128x128xf32>
    %273 = vector.shape_cast %272 : vector<1x128x128xf32> to vector<128x128xf32>
    %cst_121 = arith.constant dense<0.000000e+00> : vector<8x128xf32>
    %274 = tpu.matmul %271, %273, %cst_121 {dimension_numbers = #tpu.dot_dimension_numbers<[1], [0], [0], [1], [0, 0, 1, 1], [], []>} : vector<8x128xf32>, vector<128x128xf32>, vector<8x128xf32> -> vector<8x128xf32>
    %c19 = arith.constant 19 : index
    %c0_122 = arith.constant 0 : index
    %275 = vector.load %arg3[%c19, %c0_122] : memref<20x128xf32, #tpu.memory_space<vmem>>, vector<1x128xf32>
    %276 = vector.broadcast %275 : vector<1x128xf32> to vector<8x128xf32>
    %277 = arith.addf %274, %276 : vector<8x128xf32>
    %c0_123 = arith.constant 0 : index
    %c0_124 = arith.constant 0 : index
    %c0_125 = arith.constant 0 : index
    %278 = vector.load %arg4[%c0_123, %c0_124, %c0_125] : memref<1x8x128xf32, #tpu.memory_space<vmem>>, vector<1x8x128xf32>
    %279 = vector.shape_cast %278 : vector<1x8x128xf32> to vector<8x128xf32>
    %280 = vector.shape_cast %277 : vector<8x128xf32> to vector<1x8x128xf32>
    tpu.vector_store %arg4[%c0_123, %c0_124, %c0_125], %280 {strides = array<i32>} : memref<1x8x128xf32, #tpu.memory_space<vmem>>, vector<1x8x128xf32>,
    return
  }
  func.func @transform_0(%arg0: i32) -> (i32, i32, i32) {
    %c0_i32 = arith.constant 0 : i32
    %c0_i32_0 = arith.constant 0 : i32
    %c0_i32_1 = arith.constant 0 : i32
    return %arg0, %c0_i32, %c0_i32_0 : i32, i32, i32
  }
  func.func @transform_1(%arg0: i32) -> (i32, i32, i32) {
    %c0_i32 = arith.constant 0 : i32
    %c0_i32_0 = arith.constant 0 : i32
    %c0_i32_1 = arith.constant 0 : i32
    %c0_i32_2 = arith.constant 0 : i32
    return %c0_i32, %c0_i32_0, %c0_i32_1 : i32, i32, i32
  }
  func.func @transform_2(%arg0: i32) -> (i32, i32) {
    %c0_i32 = arith.constant 0 : i32
    %c0_i32_0 = arith.constant 0 : i32
    %c0_i32_1 = arith.constant 0 : i32
    return %c0_i32, %c0_i32_0 : i32, i32
  }
  func.func @transform_3(%arg0: i32) -> (i32, i32, i32) {
    %c0_i32 = arith.constant 0 : i32
    %c0_i32_0 = arith.constant 0 : i32
    %c0_i32_1 = arith.constant 0 : i32
    return %arg0, %c0_i32, %c0_i32_0 : i32, i32, i32
  }
}

</mosaic_0001>

<bundles_post_ra>
// kernel: tpu_custom_call.1
= control target key start
LH: loop header
LB: loop body
LE: loop exit
PB: predicated region body
PF: predicated region fallthrough
CT: control target
= control target key end

     0   :  { %8 = vsyncpa [#allocation3], 0  ;;  %s2919_s0 = inlined_call_operand.hbm [shape: f32[4,8,128], index: 0, kind: input, shape index: {}]   ;;  %s2920_s1 = inlined_call_operand.hbm [shape: f32[10,128,128], index: 1, kind: input, shape index: {}]   ;;  %s2921_s2 = inlined_call_operand.hbm [shape: f32[20,128], index: 2, kind: input, shape index: {}]   ;;  %s2922_s3 = inlined_call_operand.hbm [shape: f32[4,8,128], index: 3, kind: output, shape index: {}]  }
   0x1   :  { %10 = vsyncpa [#allocation3 + $0x1], 0 }
   0x2   :  { %11 = vsyncpa [#allocation6], 0 }
   0x3   :  { %12 = vsyncpa [#allocation4], 0 }
   0x4   :  { %14 = vsyncpa [#allocation4 + $0x1], 0  ;;  %s2572_s12 = smov 0   ;;  %s2574_s13 = smov 0  }
   0x5   :  { %s2576_s14 = smov 0   ;;  %s2578_s15 = smov 0  }
   0x6 LB: > { %s2593_s16 = sadd.s32 4294967295, %s2541_s15   ;;  %s1518_s17 = sadd.s32 4294967294, %s2541_s15   ;;  %s2541_s15 = sphi %s2578_s15, %s2941_s15   ;;  %s2537_s14 = sphi %s2576_s14, %s2940_s14   ;;  %s2533_s13 = sphi %s2574_s13, %s2939_s13   ;;  %s2529_s12 = sphi %s2572_s12, %s2938_s12  }
   0x7   : > { %p40_p0 = scmp.ne.s32.totalorder %s2533_s13, %s2529_s12  ;;  %p2923_p1 = scmp.eq.s32.totalorder %s2593_s16, 0 }
   0x8   : > { %p112_p3 = scmp.eq.s32.totalorder %s1518_s17, 3  ;;  %p1519_p5 = scmp.ge.s32.totalorder %s2541_s15, 1 }
   0x9   : > { %p2602_p4 = por %p2923_p1, %p40_p0  ;;  %p119_p7 = scmp.lt.s32.totalorder %s2541_s15, 5 }
   0xa   : > { %p2607_p6 = por %p112_p3, %p40_p0  ;;  %s2543_s21 = smov [#allocation5]  }
   0xb   : > { %s2926_s18 = scalar_select %p2602_p4, 1, 0 }
   0xc   : > { %s2927_s19 = scalar_select %p2607_p6, 1, 0 }
   0xd   : > { %p2612_p8 = pnand %p1519_p5, %p119_p7  ;;  %s131_s22 = sshll.u32 %s2543_s21, 4  ;;  %s132_s22 = int_to_ptr.vmem [resolvable:$true] %s131_s22 }
   0xe   : > { %s2544_s24 = smov [#allocation7]   ;;  %s2385_s28 = scalar_lea.hbm %s2920_s1, 20480 }
   0xf   : > { %s2928_s20 = scalar_select %p2612_p8, 1, 0 }
  0x10   : > { %p2307_p9 = pneg %p2612_p8  ;;  %s144_s25 = sshll.u32 %s2544_s24, 4  ;;  %s2624_s25 = int_to_ptr.vmem [resolvable:$true] %s144_s25 }
  0x11   : > { %p2386_p11 = scmp.ne.s32.totalorder %s2920_s1, %s2385_s28  ;;  %p2392_p3 = scmp.lt.u32.totalorder %s2385_s28, %s2920_s1 }
  0x12   : > { %p2620_p10 = pnand %p2307_p9, %p2923_p1 }
  0x14   : > { %p2387_p12 = pneg %p2620_p10 }
  0x16   : > { %p2388_p13 = pnand %p2387_p12, %p2386_p11 }
  0x18   : > { %p2389_p0 = pneg %p2388_p13 }
  0x1a   : > { %p2394_p5 = pnand %p2392_p3, %p2389_p0 }
  0x1c   : > { %2397 = shalt.err (!%p2394_p5)
}
  0x1d   : > { %s2398_s6 = scalar_lea.vmem %s132_s22, 20480  ;;  %p2406_p2 = scmp.lt.s32.totalorder %s132_s22, %s132_s22 }
  0x1e   : > { %p2399_p7 = scmp.ne.s32.totalorder %s132_s22, %s2398_s6  ;;  %p2407_p6 = scmp.lt.s32.totalorder %s2398_s6, %s2398_s6 }
  0x20   : > { %p2401_p9 = pnand %p2399_p7, %p2387_p12  ;;  %p2408_p4 = por %p2407_p6, %p2406_p2 }
  0x22   : > { %p2402_p1 = pneg %p2401_p9 }
  0x24   : > { %p2409_p8 = pnand %p2408_p4, %p2402_p1 }
  0x26   : > { %2412 = shalt.err (!%p2409_p8)
}
  0x27   : > { %s2545_s7 = smov 128   ;;  %s2546_s8 = smov 8  }
  0x28   : > { %2310 = dma.hbm_to_vmem [thread:$0]  (!%p2620_p10), %s2920_s1, 20480, %s132_s22, [#allocation6], %s2545_s7, %s2545_s7, %s2546_s8  }
  0x29   : > { %s2413_s21 = scalar_lea.hbm %s2921_s2, 384 }
  0x2a   : > { %p2414_p11 = scmp.ne.s32.totalorder %s2921_s2, %s2413_s21  ;;  %p2420_p4 = scmp.lt.u32.totalorder %s2413_s21, %s2921_s2 }
  0x2c   : > { %p2416_p1 = pnand %p2414_p11, %p2387_p12 }
  0x2e   : > { %p2417_p2 = pneg %p2416_p1 }
  0x30   : > { %p2422_p6 = pnand %p2420_p4, %p2417_p2 }
  0x32   : > { %2425 = shalt.err (!%p2422_p6)
}
  0x33   : > { %s2426_s22 = scalar_lea.vmem %s2624_s25, 384  ;;  %p2434_p3 = scmp.lt.s32.totalorder %s2624_s25, %s2624_s25 }
  0x34   : > { %p2427_p8 = scmp.ne.s32.totalorder %s2624_s25, %s2426_s22  ;;  %p2435_p5 = scmp.lt.s32.totalorder %s2426_s22, %s2426_s22 }
  0x36   : > { %p2429_p13 = pnand %p2427_p8, %p2387_p12  ;;  %p2436_p7 = por %p2435_p5, %p2434_p3 }
  0x38   : > { %p2430_p0 = pneg %p2429_p13 }
  0x3a   : > { %p2437_p9 = pnand %p2436_p7, %p2430_p0 }
  0x3c   : > { %2440 = shalt.err (!%p2437_p9)
}
  0x3d   : > { %2313 = dma.hbm_to_vmem [thread:$0]  (!%p2620_p10), %s2921_s2, 384, %s2624_s25, [#allocation6], %s2545_s7, %s2545_s7, %s2546_s8  }
  0x3e   : > { %s2674_s4 = sadd.s32 1, %s2541_s15   ;;  %s27_s23 = sadd.s32 1, %s2537_s14 }
  0x3f   : > { %s24_s5 = ssub.s32 %s2541_s15, %s2674_s4  ;;  %p34_p12 = scmp.ne.s32.totalorder %s2537_s14, %s2533_s13 }
  0x40   : > { %p25_p11 = scmp.eq.s32.totalorder %s24_s5, 0  ;;  %p35_p1 = scmp.eq.s32.totalorder %s2541_s15, 0 }
  0x41   : > { %p2930_p2 = scmp.eq.s32.totalorder %s2593_s16, 3  ;;  %p2324_p6 = scmp.lt.s32.totalorder %s2541_s15, 4 }
  0x42   : > { %s2690_s9 = scalar_select %p25_p11, %s2537_s14, %s27_s23  }
  0x43   : > { %p2684_p4 = por %p2930_p2, %p34_p12  ;;  %p36_p8 = por %p35_p1, %p34_p12 }
  0x44   : > { %s158_s10 = sand.u32 1, %s2537_s14   ;;  %s1524_s25 = sshll.u32 %s2541_s15, 7 }
  0x45   : > { %s1523_s11 = sshll.u32 %s158_s10, 3  ;;  %s2697_s17 = scalar_lea.hbm %s2919_s0, %s1524_s25 }
  0x46   : > { %s162_s21 = scalar_lea.vmem [#allocation2], %s1523_s11  ;;  %p2701_p10 = pnand %p2324_p6, %p36_p8 }
  0x47   : > { %s169_s24 = sshll.u32 %s162_s21, 4  ;;  %s159_s27 = scalar_lea.sflag [#allocation3], %s158_s10  ;;  %s2699_s24 = int_to_ptr.vmem [resolvable:$true] %s169_s24 }
  0x48   : > { %s2441_s28 = scalar_lea.hbm %s2697_s17, 128  ;;  %p2443_p0 = pneg %p2701_p10 }
  0x49   : > { %p2442_p13 = scmp.ne.s32.totalorder %s2697_s17, %s2441_s28  ;;  %s2446_s30 = scalar_lea.hbm %s2919_s0, 512 }
  0x4a   : > { %p2447_p7 = scmp.lt.u32.totalorder %s2697_s17, %s2919_s0  ;;  %p2448_p9 = scmp.lt.u32.totalorder %s2446_s30, %s2441_s28 }
  0x4b   : > { %p2444_p3 = pnand %p2443_p0, %p2442_p13  ;;  %p2450_p11 = scmp.lt.u32.totalorder %s2441_s28, %s2697_s17 }
  0x4c   : > { %p2449_p12 = por %p2448_p9, %p2447_p7 }
  0x4d   : > { %p2445_p5 = pneg %p2444_p3 }
  0x4e   : > { %p2451_p1 = por %p2450_p11, %p2449_p12 }
  0x50   : > { %p2452_p2 = pnand %p2451_p1, %p2445_p5 }
  0x52   : > { %2455 = shalt.err (!%p2452_p2)
}
  0x53   : > { %s2456_s10 = scalar_lea.vmem %s2699_s24, 128  ;;  %s2547_s11 = smov [#allocation2]  }
  0x54   : > { %p2457_p6 = scmp.ne.s32.totalorder %s2699_s24, %s2456_s10  ;;  %s2461_s25 = sshll.u32 %s2547_s11, 4  ;;  %s2462_s25 = int_to_ptr.vmem [resolvable:$false] %s2461_s25 }
  0x55   : > { %s2463_s7 = scalar_lea.vmem %s2462_s25, 256  ;;  %p2464_p3 = scmp.lt.s32.totalorder %s2699_s24, %s2462_s25 }
  0x56   : > { %p2459_p8 = pnand %p2457_p6, %p2443_p0  ;;  %p2465_p7 = scmp.lt.s32.totalorder %s2463_s7, %s2456_s10 }
  0x58   : > { %p2460_p13 = pneg %p2459_p8  ;;  %p2466_p9 = por %p2465_p7, %p2464_p3 }
  0x5a   : > { %p2467_p12 = pnand %p2466_p9, %p2460_p13 }
  0x5c   : > { %2470 = shalt.err (!%p2467_p12)
}
  0x5d   : > { %2317 = dma.hbm_to_vmem [thread:$0]  (!%p2701_p10), %s2697_s17, 128, %s2699_s24, %s159_s27  }
  0x5e   : > { %p2933_p5 = scmp.ne.s32.totalorder %s2928_s20, 0 }
  0x5f   : > { %s2733_s8 = sand.u32 (!%p2933_p5), 1, %s2533_s13   ;;  %p2934_p0 = scmp.ne.s32.totalorder (!%p2933_p5), %s2926_s18, 0 }
  0x60   : > { %178 = sbr.rel (%p2933_p5) target bundleno = 2682 (0xa7a), region = 32  ;;  %s1526_s21 = sshll.u32 (!%p2933_p5), %s2733_s8, 3 }
  0x61   : > { %s181_s28 = scalar_lea.sflag (!%p2933_p5), [#allocation3], %s2733_s8  ;;  %s2739_s22 = scalar_lea.vmem (!%p2933_p5), [#allocation2], %s1526_s21 }
  0x67   : > { %2516 = dma.done.wait (%p2934_p0), %s181_s28, 128  }
  0x68   : > { %2518 = vsyncadd (%p2934_p0), %s181_s28, 4294967168  ;;  %p2935_p10 = scmp.eq.s32.totalorder %s2593_s16, 0 }
  0x6a   : > { %2520 = dma.done.wait (%p2935_p10), [#allocation6], 20864   ;;  %p2936_p11 = pmov %p2935_p10 }
  0x6b   : > { %v2548_v0 = vmov 0.0|0.0   ;;  %vm2549_vm0 = vmmov 0   ;;  %v2550_v1 = vmov 0.0   ;;  %v216_v2 = vld [vmem:[#allocation5] sm:$0xff]  ;;  %v217_v3 = vld [vmem:[#allocation5 + $0x8] sm:$0xff]  ;;  %v218_v4 = vld [vmem:[#allocation5 + $0x10] sm:$0xff] }
  0x6c   : > { %2522 = vsyncadd (%p2936_p11), [#allocation6], 4294946432  ;;  %2055 = vmatprep.subr.bf16.mxu0 %v2548_v0  ;;  %1737 = vmatprep.mubr.msk.f32.mxu0 %vm2549_vm0, %v2550_v1  ;;  %v2056_v5 = vpack.c.bf16 %v217_v3, %v216_v2  ;;  %v219_v6 = vld [vmem:[#allocation5 + $0x18] sm:$0xff]  ;;  %v220_v8 = vld [vmem:[#allocation5 + $0x20] sm:$0xff]  ;;  %s1532_s18 = sshll.u32 %s2593_s16, 7  ;;  %s214_s20 = scalar_lea.vmem [#allocation8], %s1526_s21 }
  0x6d   : > { %2079 = vmatprep.subr.bf16.mxu1 %v2548_v0  ;;  %1772 = vmatprep.mubr.msk.f32.mxu1 %vm2549_vm0, %v2550_v1  ;;  %v2059_v7 = vpack.c.bf16 %v219_v6, %v218_v4  ;;  %v221_v9 = vld [vmem:[#allocation5 + $0x28] sm:$0xff]  ;;  %v222_v11 = vld [vmem:[#allocation5 + $0x30] sm:$0xff]  ;;  %v223_v12 = vld [vmem:[#allocation5 + $0x38] sm:$0xff]  ;;  %s1429_s17 = sshll.u32 %s214_s20, 4  ;;  %s2876_s27 = scalar_lea.hbm %s2922_s3, %s1532_s18  ;;  %s2878_s17 = int_to_ptr.vmem [resolvable:$true] %s1429_s17 }
  0x6e   : > { %2057 = vmatpush3.bf16.msra.mxu0 %v2056_v5  ;;  %v2062_v10 = vpack.c.bf16 %v221_v9, %v220_v8  ;;  %v2065_v13 = vpack.c.bf16 %v223_v12, %v222_v11  ;;  %v224_v14 = vld [vmem:[#allocation5 + $0x40] sm:$0xff]  ;;  %v225_v15 = vld [vmem:[#allocation5 + $0x48] sm:$0xff]  ;;  %v226_v17 = vld [vmem:[#allocation5 + $0x50] sm:$0xff]  ;;  %s1416_s29 = scalar_lea.sflag [#allocation4], %s2733_s8  ;;  %s2471_s30 = scalar_lea.vmem %s2878_s17, 128 }
  0x6f   : > { %2058 = vmatprep.subr.bf16.mxu0 %v2548_v0  ;;  %v2068_v16 = vpack.c.bf16 %v225_v15, %v224_v14  ;;  %v227_v18 = vld [vmem:[#allocation5 + $0x58] sm:$0xff]  ;;  %v228_v20 = vld [vmem:[#allocation5 + $0x60] sm:$0xff]  ;;  %v229_v21 = vld [vmem:[#allocation5 + $0x68] sm:$0xff]  ;;  %p2472_p1 = scmp.ne.s32.totalorder %s2878_s17, %s2471_s30  ;;  %s2551_s16 = smov [#allocation8]  }
  0x70   : > { %v2071_v19 = vpack.c.bf16 %v227_v18, %v226_v17  ;;  %v2074_v22 = vpack.c.bf16 %v229_v21, %v228_v20  ;;  %v230_v23 = vld [vmem:[#allocation5 + $0x70] sm:$0xff]  ;;  %v231_v24 = vld [vmem:[#allocation5 + $0x78] sm:$0xff]  ;;  %v339_v27 = vld [vmem:[#allocation5 + $0x80] sm:$0xff]  ;;  %s2475_s23 = sshll.u32 %s2551_s16, 4  ;;  %s2476_s23 = int_to_ptr.vmem [resolvable:$false] %s2475_s23 }
  0x71   : > { %v2077_v25 = vpack.c.bf16 %v231_v24, %v230_v23  ;;  %v215_v26 = vld [vmem:[%s2739_s22] sm:$0xff]  ;;  %v340_v28 = vld [vmem:[#allocation5 + $0x88] sm:$0xff]  ;;  %v343_v33 = vld [vmem:[#allocation5 + $0xa0] sm:$0xff]  ;;  %p2473_p2 = pnand %p2472_p1, %p2684_p4  ;;  %s2477_s5 = scalar_lea.vmem %s2476_s23, 256 }
  0x72   : > { %2060 = vmatpush3.bf16.msra.mxu0 %v2059_v7  ;;  %v2080_v29 = vpack.c.bf16 %v340_v28, %v339_v27  ;;  %v341_v30 = vld [vmem:[#allocation5 + $0x90] sm:$0xff]  ;;  %v342_v31 = vld [vmem:[#allocation5 + $0x98] sm:$0xff]  ;;  %v344_v34 = vld [vmem:[#allocation5 + $0xa8] sm:$0xff]  ;;  %p2478_p8 = scmp.lt.s32.totalorder %s2878_s17, %s2476_s23  ;;  %p2479_p13 = scmp.lt.s32.totalorder %s2477_s5, %s2471_s30 }
  0x73   : > { %2061 = vmatprep.subr.bf16.mxu0 %v2548_v0  ;;  %v2083_v32 = vpack.c.bf16 %v342_v31, %v341_v30  ;;  %v2086_v35 = vpack.c.bf16 %v344_v34, %v343_v33  ;;  %v345_v36 = vld [vmem:[#allocation5 + $0xb0] sm:$0xff]  ;;  %v346_v37 = vld [vmem:[#allocation5 + $0xb8] sm:$0xff]  ;;  %v347_v39 = vld [vmem:[#allocation5 + $0xc0] sm:$0xff]  ;;  %p2474_p6 = pneg %p2473_p2 }
  0x74   : > { %2081 = vmatpush3.bf16.msra.mxu1 %v2080_v29  ;;  %v2089_v38 = vpack.c.bf16 %v346_v37, %v345_v36  ;;  %v348_v40 = vld [vmem:[#allocation5 + $0xc8] sm:$0xff]  ;;  %v349_v42 = vld [vmem:[#allocation5 + $0xd0] sm:$0xff]  ;;  %v350_v43 = vld [vmem:[#allocation5 + $0xd8] sm:$0xff]  ;;  %p2480_p3 = por %p2479_p13, %p2478_p8 }
  0x75   : > { %2082 = vmatprep.subr.bf16.mxu1 %v2548_v0  ;;  %v2092_v41 = vpack.c.bf16 %v348_v40, %v347_v39  ;;  %v2095_v44 = vpack.c.bf16 %v350_v43, %v349_v42  ;;  %v351_v45 = vld [vmem:[#allocation5 + $0xe0] sm:$0xff]  ;;  %v352_v46 = vld [vmem:[#allocation5 + $0xe8] sm:$0xff]  ;;  %v353_v48 = vld [vmem:[#allocation5 + $0xf0] sm:$0xff] }
  0x76   : > { %2063 = vmatpush3.bf16.msra.mxu0 %v2062_v10  ;;  %v2098_v47 = vpack.c.bf16 %v352_v46, %v351_v45  ;;  %v354_v49 = vld [vmem:[#allocation5 + $0xf8] sm:$0xff]  ;;  %v327_v10 = vlaneseq  ;;  %v302_v12 = vld [vmem:[#allocation7] sm:$0x1]  ;;  %v464_v27 = vld [vmem:[#allocation5 + $0x110] sm:$0xff]  ;;  %p2481_p7 = pnand %p2480_p3, %p2474_p6 }
  0x77   : > { %2064 = vmatprep.subr.bf16.mxu0 %v2548_v0  ;;  %v2101_v50 = vpack.c.bf16 %v354_v49, %v353_v48  ;;  %v462_v24 = vld [vmem:[#allocation5 + $0x100] sm:$0xff]  ;;  %v465_v28 = vld [vmem:[#allocation5 + $0x118] sm:$0xff]  ;;  %v467_v31 = vld [vmem:[#allocation5 + $0x128] sm:$0xff] }
  0x78   : > { %2084 = vmatpush3.bf16.msra.mxu1 %v2083_v32  ;;  %v328_v11 = vshrl.u32 %v327_v10, 7  ;;  %v2107_v29 = vpack.c.bf16 %v465_v28, %v464_v27  ;;  %v466_v30 = vld [vmem:[#allocation5 + $0x120] sm:$0xff]  ;;  %v468_v33 = vld [vmem:[#allocation5 + $0x130] sm:$0xff]  ;;  %v469_v34 = vld [vmem:[#allocation5 + $0x138] sm:$0xff] }
  0x79   : > { %2085 = vmatprep.subr.bf16.mxu1 %v2548_v0  ;;  %v2110_v32 = vpack.c.bf16 %v467_v31, %v466_v30  ;;  %v470_v36 = vld [vmem:[#allocation5 + $0x140] sm:$0xff]  ;;  %v471_v37 = vld [vmem:[#allocation5 + $0x148] sm:$0xff]  ;;  %v472_v39 = vld [vmem:[#allocation5 + $0x150] sm:$0xff] }
  0x7a   : > { %2066 = vmatpush3.bf16.msra.mxu0 %v2065_v13  ;;  %v2774_v13 = vsub.s32 0, %v328_v11  ;;  %v473_v40 = vld [vmem:[#allocation5 + $0x158] sm:$0xff]  ;;  %v474_v42 = vld [vmem:[#allocation5 + $0x160] sm:$0xff]  ;;  %v475_v43 = vld [vmem:[#allocation5 + $0x168] sm:$0xff] }
  0x7b   : > { %2067 = vmatprep.subr.bf16.mxu0 %v2548_v0  ;;  %v476_v45 = vld [vmem:[#allocation5 + $0x170] sm:$0xff]  ;;  %v477_v46 = vld [vmem:[#allocation5 + $0x178] sm:$0xff]  ;;  %v426_v10 = vld [vmem:[#allocation7 + $0xb] sm:$0x1] }
  0x7c   : > { %2087 = vmatpush3.bf16.msra.mxu1 %v2086_v35  ;;  %v2113_v35 = vpack.c.bf16 %v469_v34, %v468_v33  ;;  %v591_v28 = vld [vmem:[#allocation5 + $0x1b0] sm:$0xff]  ;;  %v593_v31 = vld [vmem:[#allocation5 + $0x1c0] sm:$0xff] }
  0x7d   : > { %2088 = vmatprep.subr.bf16.mxu1 %v2548_v0  ;;  %v595_v34 = vld [vmem:[#allocation5 + $0x1d0] sm:$0xff] }
  0x7e   : > { %2069 = vmatpush3.bf16.msra.mxu0 %v2068_v16  ;;  %v303_v16 = vld [vmem:[#allocation7 + $0xa] sm:$0x1] }
  0x7f   : > { %2070 = vmatprep.subr.bf16.mxu0 %v2548_v0 }
  0x80   : > { %2090 = vmatpush3.bf16.msra.mxu1 %v2089_v38  ;;  %v2116_v38 = vpack.c.bf16 %v471_v37, %v470_v36  ;;  %v597_v37 = vld [vmem:[#allocation5 + $0x1e0] sm:$0xff] }
  0x81   : > { %2091 = vmatprep.subr.bf16.mxu1 %v2548_v0 }
  0x82   : > { %2072 = vmatpush3.bf16.msra.mxu0 %v2071_v19 }
  0x83   : > { %2073 = vmatprep.subr.bf16.mxu0 %v2548_v0 }
  0x84   : > { %2093 = vmatpush3.bf16.msra.mxu1 %v2092_v41  ;;  %v2119_v41 = vpack.c.bf16 %v473_v40, %v472_v39  ;;  %v599_v40 = vld [vmem:[#allocation5 + $0x1f0] sm:$0xff] }
  0x85   : > { %2094 = vmatprep.subr.bf16.mxu1 %v2548_v0 }
  0x86   : > { %2075 = vmatpush3.bf16.msra.mxu0 %v2074_v22 }
  0x87   : > { %2076 = vmatprep.subr.bf16.mxu0 %v2548_v0 }
  0x88   : > { %2096 = vmatpush3.bf16.msra.mxu1 %v2095_v44  ;;  %v2122_v44 = vpack.c.bf16 %v475_v43, %v474_v42 }
  0x89   : > { %2097 = vmatprep.subr.bf16.mxu1 %v2548_v0 }
  0x8a   : > { %2078 = vmatpush3.bf16.msra.mxu0 %v2077_v25  ;;  %v463_v25 = vld [vmem:[#allocation5 + $0x108] sm:$0xff] }
  0x8b   : > { %2103 = vmatprep.subr.bf16.mxu0 %v2548_v0 }
  0x8c   : > { %2099 = vmatpush3.bf16.msra.mxu1 %v2098_v47  ;;  %v2125_v47 = vpack.c.bf16 %v477_v46, %v476_v45 }
  0x8d   : > { %1738 = vmatmul.mubr.f32.vlgmr.msra.gmra.mrb[0].mxu0 %v215_v26  ;;  %2100 = vmatprep.subr.bf16.mxu1 %v2548_v0  ;;  %v2104_v26 = vpack.c.bf16 %v463_v25, %v462_v24  ;;  %v589_v25 = vld [vmem:[#allocation5 + $0x1a0] sm:$0xff] }
  0x8e   : > { %1807 = vmatprep.mubr.msk.f32.mxu0 %vm2549_vm0, %v2550_v1 }
  0x8f   : > { %2105 = vmatpush3.bf16.msra.mxu0 %v2104_v26  ;;  %v590_v26 = vld [vmem:[#allocation5 + $0x1a8] sm:$0xff] }
  0x90   : > { %2102 = vmatpush3.bf16.msra.mxu1 %v2101_v50  ;;  %2106 = vmatprep.subr.bf16.mxu0 %v2548_v0  ;;  %v2134_v27 = vpack.c.bf16 %v590_v26, %v589_v25  ;;  %v716_v26 = vld [vmem:[#allocation5 + $0x240] sm:$0xff] }
  0x91   : > { %2127 = vmatprep.subr.bf16.mxu1 %v2548_v0 }
  0x93   : > { %2108 = vmatpush3.bf16.msra.mxu0 %v2107_v29  ;;  %v592_v29 = vld [vmem:[#allocation5 + $0x1b8] sm:$0xff] }
  0x94   : > { %2109 = vmatprep.subr.bf16.mxu0 %v2548_v0  ;;  %v2137_v30 = vpack.c.bf16 %v592_v29, %v591_v28  ;;  %v718_v29 = vld [vmem:[#allocation5 + $0x250] sm:$0xff] }
  0x97   : > { %2111 = vmatpush3.bf16.msra.mxu0 %v2110_v32  ;;  %v594_v32 = vld [vmem:[#allocation5 + $0x1c8] sm:$0xff] }
  0x98   : > { %2112 = vmatprep.subr.bf16.mxu0 %v2548_v0  ;;  %v2140_v33 = vpack.c.bf16 %v594_v32, %v593_v31  ;;  %v720_v32 = vld [vmem:[#allocation5 + $0x260] sm:$0xff] }
  0x9b   : > { %2114 = vmatpush3.bf16.msra.mxu0 %v2113_v35  ;;  %v596_v35 = vld [vmem:[#allocation5 + $0x1d8] sm:$0xff] }
  0x9c   : > { %2115 = vmatprep.subr.bf16.mxu0 %v2548_v0  ;;  %v2143_v36 = vpack.c.bf16 %v596_v35, %v595_v34  ;;  %v722_v35 = vld [vmem:[#allocation5 + $0x270] sm:$0xff] }
  0x9f   : > { %2117 = vmatpush3.bf16.msra.mxu0 %v2116_v38  ;;  %v598_v38 = vld [vmem:[#allocation5 + $0x1e8] sm:$0xff] }
  0xa0   : > { %2118 = vmatprep.subr.bf16.mxu0 %v2548_v0  ;;  %v2146_v39 = vpack.c.bf16 %v598_v38, %v597_v37 }
  0xa3   : > { %2120 = vmatpush3.bf16.msra.mxu0 %v2119_v41  ;;  %v600_v41 = vld [vmem:[#allocation5 + $0x1f8] sm:$0xff] }
  0xa4   : > { %2121 = vmatprep.subr.bf16.mxu0 %v2548_v0  ;;  %v2149_v42 = vpack.c.bf16 %v600_v41, %v599_v40 }
  0xa7   : > { %2123 = vmatpush3.bf16.msra.mxu0 %v2122_v44 }
  0xa8   : > { %2124 = vmatprep.subr.bf16.mxu0 %v2548_v0 }
  0xab   : > { %2126 = vmatpush3.bf16.msra.mxu0 %v2125_v47 }
  0xac   : > { %2151 = vmatprep.subr.bf16.mxu0 %v2548_v0 }
 0x160   : > { %v298_v51 = vpop.f32.mrb[0].mxu0 }
 0x161   : > { %v304_v52 = vrot.slane %v298_v51, 4  ;;  %v310_v53 = vmul.f32 %v298_v51, %v298_v51  ;;  %v1739_v54 = vpop.f32.mrb[1].mxu0 }
 0x163   : > { %v305_v55 = vadd.f32 %v304_v52, %v298_v51  ;;  %v311_v56 = vrot.slane %v310_v53, 4 }
 0x165   : > { %v306_v57 = vrot.slane %v305_v55, 2  ;;  %v312_v58 = vadd.f32 %v311_v56, %v310_v53 }
 0x167   : > { %v307_v59 = vadd.f32 %v306_v57, %v305_v55  ;;  %v313_v60 = vrot.slane %v312_v58, 2 }
 0x169   : > { %v308_v61 = vrot.slane %v307_v59, 1  ;;  %v314_v62 = vadd.f32 %v313_v60, %v312_v58 }
 0x16b   : > { %v309_v63 = vadd.f32 %v308_v61, %v307_v59  ;;  %v315_v2 = vrot.slane %v314_v62, 1 }
 0x16d   : > { %v316_v3 = vadd.f32 %v315_v2, %v314_v62  ;;  %v317_v4 = vmul.f32 0.125, %v309_v63 }
 0x16f   : > { %v318_v5 = vmul.f32 0.125, %v316_v3  ;;  %v319_v6 = vmul.f32 %v317_v4, %v317_v4 }
 0x171   : > { %v320_v7 = vsub.f32 %v318_v5, %v319_v6 }
 0x173   : > { %v321_v8 = vmax.f32 %v320_v7, 0.0  ;;  %v425_v7 = vld [vmem:[#allocation7 + $0x1] sm:$0x1] }
 0x175   : > { %v322_v9 = vadd.f32 1e-05, %v321_v8 }
 0x177   : > { %2367 = vrsqrt.f32 %v322_v9 }
 0x181   : > { %v2368_v14 = vpop.eup %2367 }
 0x182   : > { %v324_v15 = vmul.f32 %v2368_v14, %v302_v12 }
 0x184   : > { %v330_v17 = vrot.slane %v324_v15, %v2774_v13  ;;  %v325_v18 = vmul.f32 %v324_v15, %v317_v4 }
 0x186   : > { %v326_v19 = vsub.f32 %v303_v16, %v325_v18  ;;  %v331_v20 = vmul.f32 %v330_v17, %v298_v51 }
 0x188   : > { %v335_v21 = vrot.slane %v326_v19, %v2774_v13  ;;  %v585_v19 = vld [vmem:[#allocation5 + $0x180] sm:$0xff] }
 0x18a   : > { %v336_v22 = vadd.f32 %v335_v21, %v331_v20  ;;  %v586_v20 = vld [vmem:[#allocation5 + $0x188] sm:$0xff] }
 0x18b   : > { %v2128_v21 = vpack.c.bf16 %v586_v20, %v585_v19  ;;  %v712_v20 = vld [vmem:[#allocation5 + $0x220] sm:$0xff] }
 0x18c   : > { %v337_v23 = vmax.f32 %v336_v22, 0.0  ;;  %v587_v22 = vld [vmem:[#allocation5 + $0x190] sm:$0xff] }
 0x18e   : > { %1773 = vmatmul.mubr.f32.vlgmr.msra.gmra.mrb[0].mxu1 %v337_v23  ;;  %v588_v23 = vld [vmem:[#allocation5 + $0x198] sm:$0xff] }
 0x18f   : > { %1842 = vmatprep.mubr.msk.f32.mxu1 %vm2549_vm0, %v2550_v1  ;;  %2129 = vmatpush3.bf16.msra.mxu1 %v2128_v21  ;;  %v2131_v24 = vpack.c.bf16 %v588_v23, %v587_v22  ;;  %v713_v21 = vld [vmem:[#allocation5 + $0x228] sm:$0xff]  ;;  %v714_v23 = vld [vmem:[#allocation5 + $0x230] sm:$0xff] }
 0x190   : > { %2130 = vmatprep.subr.bf16.mxu1 %v2548_v0  ;;  %v2158_v22 = vpack.c.bf16 %v713_v21, %v712_v20  ;;  %v839_v21 = vld [vmem:[#allocation5 + $0x2c0] sm:$0xff] }
 0x193   : > { %2132 = vmatpush3.bf16.msra.mxu1 %v2131_v24  ;;  %v715_v24 = vld [vmem:[#allocation5 + $0x238] sm:$0xff] }
 0x194   : > { %2133 = vmatprep.subr.bf16.mxu1 %v2548_v0  ;;  %v2161_v25 = vpack.c.bf16 %v715_v24, %v714_v23  ;;  %v841_v24 = vld [vmem:[#allocation5 + $0x2d0] sm:$0xff] }
 0x197   : > { %2135 = vmatpush3.bf16.msra.mxu1 %v2134_v27  ;;  %v717_v27 = vld [vmem:[#allocation5 + $0x248] sm:$0xff] }
 0x198   : > { %2136 = vmatprep.subr.bf16.mxu1 %v2548_v0  ;;  %v2164_v28 = vpack.c.bf16 %v717_v27, %v716_v26  ;;  %v843_v27 = vld [vmem:[#allocation5 + $0x2e0] sm:$0xff] }
 0x19b   : > { %2138 = vmatpush3.bf16.msra.mxu1 %v2137_v30  ;;  %v719_v30 = vld [vmem:[#allocation5 + $0x258] sm:$0xff] }
 0x19c   : > { %2139 = vmatprep.subr.bf16.mxu1 %v2548_v0  ;;  %v2167_v31 = vpack.c.bf16 %v719_v30, %v718_v29  ;;  %v845_v30 = vld [vmem:[#allocation5 + $0x2f0] sm:$0xff] }
 0x19f   : > { %2141 = vmatpush3.bf16.msra.mxu1 %v2140_v33  ;;  %v721_v33 = vld [vmem:[#allocation5 + $0x268] sm:$0xff] }
 0x1a0   : > { %2142 = vmatprep.subr.bf16.mxu1 %v2548_v0  ;;  %v2170_v34 = vpack.c.bf16 %v721_v33, %v720_v32 }
 0x1a3   : > { %2144 = vmatpush3.bf16.msra.mxu1 %v2143_v36  ;;  %v723_v36 = vld [vmem:[#allocation5 + $0x278] sm:$0xff] }
 0x1a4   : > { %2145 = vmatprep.subr.bf16.mxu1 %v2548_v0  ;;  %v2173_v37 = vpack.c.bf16 %v723_v36, %v722_v35 }
 0x1a7   : > { %2147 = vmatpush3.bf16.msra.mxu1 %v2146_v39 }
 0x1a8   : > { %2148 = vmatprep.subr.bf16.mxu1 %v2548_v0 }
 0x1ab   : > { %2150 = vmatpush3.bf16.msra.mxu1 %v2149_v42 }
 0x1ac   : > { %2175 = vmatprep.subr.bf16.mxu1 %v2548_v0 }
 0x261   : > { %v421_v48 = vpop.f32.mrb[0].mxu1 }
 0x262   : > { %v427_v49 = vrot.slane %v421_v48, 4  ;;  %v433_v50 = vmul.f32 %v421_v48, %v421_v48  ;;  %v1774_v51 = vpop.f32.mrb[1].mxu1 }
 0x264   : > { %v428_v52 = vadd.f32 %v427_v49, %v421_v48  ;;  %v434_v53 = vrot.slane %v433_v50, 4 }
 0x266   : > { %v429_v54 = vrot.slane %v428_v52, 2  ;;  %v435_v55 = vadd.f32 %v434_v53, %v433_v50 }
 0x268   : > { %v430_v56 = vadd.f32 %v429_v54, %v428_v52  ;;  %v436_v57 = vrot.slane %v435_v55, 2 }
 0x26a   : > { %v431_v58 = vrot.slane %v430_v56, 1  ;;  %v437_v59 = vadd.f32 %v436_v57, %v435_v55 }
 0x26c   : > { %v432_v60 = vadd.f32 %v431_v58, %v430_v56  ;;  %v438_v61 = vrot.slane %v437_v59, 1 }
 0x26e   : > { %v439_v62 = vadd.f32 %v438_v61, %v437_v59  ;;  %v440_v63 = vmul.f32 0.125, %v432_v60 }
 0x270   : > { %v441_v2 = vmul.f32 0.125, %v439_v62  ;;  %v442_v3 = vmul.f32 %v440_v63, %v440_v63 }
 0x272   : > { %v443_v4 = vsub.f32 %v441_v2, %v442_v3  ;;  %v548_v2 = vld [vmem:[#allocation7 + $0x2] sm:$0x1] }
 0x274   : > { %v444_v5 = vmax.f32 %v443_v4, 0.0 }
 0x276   : > { %v445_v6 = vadd.f32 1e-05, %v444_v5  ;;  %v549_v5 = vld [vmem:[#allocation7 + $0xc] sm:$0x1] }
 0x278   : > { %2369 = vrsqrt.f32 %v445_v6 }
 0x282   : > { %v2370_v8 = vpop.eup %2369 }
 0x283   : > { %v447_v9 = vmul.f32 %v2370_v8, %v425_v7 }
 0x285   : > { %v448_v11 = vmul.f32 %v447_v9, %v440_v63  ;;  %v453_v12 = vrot.slane %v447_v9, %v2774_v13 }
 0x287   : > { %v449_v14 = vsub.f32 %v426_v10, %v448_v11  ;;  %v454_v15 = vmul.f32 %v453_v12, %v421_v48 }
 0x289   : > { %v458_v16 = vrot.slane %v449_v14, %v2774_v13  ;;  %v708_v14 = vld [vmem:[#allocation5 + $0x200] sm:$0xff] }
 0x28b   : > { %v459_v17 = vadd.f32 %v458_v16, %v454_v15  ;;  %v709_v15 = vld [vmem:[#allocation5 + $0x208] sm:$0xff] }
 0x28c   : > { %v2152_v16 = vpack.c.bf16 %v709_v15, %v708_v14  ;;  %v835_v15 = vld [vmem:[#allocation5 + $0x2a0] sm:$0xff] }
 0x28d   : > { %v460_v18 = vmax.f32 %v459_v17, 0.0  ;;  %v710_v17 = vld [vmem:[#allocation5 + $0x210] sm:$0xff] }
 0x28f   : > { %1808 = vmatmul.mubr.f32.vlgmr.msra.gmra.mrb[2].mxu0 %v460_v18  ;;  %v711_v18 = vld [vmem:[#allocation5 + $0x218] sm:$0xff] }
 0x290   : > { %1877 = vmatprep.mubr.msk.f32.mxu0 %vm2549_vm0, %v2550_v1  ;;  %2153 = vmatpush3.bf16.msra.mxu0 %v2152_v16  ;;  %v2155_v19 = vpack.c.bf16 %v711_v18, %v710_v17  ;;  %v836_v16 = vld [vmem:[#allocation5 + $0x2a8] sm:$0xff]  ;;  %v837_v18 = vld [vmem:[#allocation5 + $0x2b0] sm:$0xff] }
 0x291   : > { %2154 = vmatprep.subr.bf16.mxu0 %v2548_v0  ;;  %v2182_v17 = vpack.c.bf16 %v836_v16, %v835_v15  ;;  %v962_v16 = vld [vmem:[#allocation5 + $0x340] sm:$0xff] }
 0x294   : > { %2156 = vmatpush3.bf16.msra.mxu0 %v2155_v19  ;;  %v838_v19 = vld [vmem:[#allocation5 + $0x2b8] sm:$0xff] }
 0x295   : > { %2157 = vmatprep.subr.bf16.mxu0 %v2548_v0  ;;  %v2185_v20 = vpack.c.bf16 %v838_v19, %v837_v18  ;;  %v964_v19 = vld [vmem:[#allocation5 + $0x350] sm:$0xff] }
 0x298   : > { %2159 = vmatpush3.bf16.msra.mxu0 %v2158_v22  ;;  %v840_v22 = vld [vmem:[#allocation5 + $0x2c8] sm:$0xff] }
 0x299   : > { %2160 = vmatprep.subr.bf16.mxu0 %v2548_v0  ;;  %v2188_v23 = vpack.c.bf16 %v840_v22, %v839_v21  ;;  %v966_v22 = vld [vmem:[#allocation5 + $0x360] sm:$0xff] }
 0x29c   : > { %2162 = vmatpush3.bf16.msra.mxu0 %v2161_v25  ;;  %v842_v25 = vld [vmem:[#allocation5 + $0x2d8] sm:$0xff] }
 0x29d   : > { %2163 = vmatprep.subr.bf16.mxu0 %v2548_v0  ;;  %v2191_v26 = vpack.c.bf16 %v842_v25, %v841_v24  ;;  %v968_v25 = vld [vmem:[#allocation5 + $0x370] sm:$0xff] }
 0x2a0   : > { %2165 = vmatpush3.bf16.msra.mxu0 %v2164_v28  ;;  %v844_v28 = vld [vmem:[#allocation5 + $0x2e8] sm:$0xff] }
 0x2a1   : > { %2166 = vmatprep.subr.bf16.mxu0 %v2548_v0  ;;  %v2194_v29 = vpack.c.bf16 %v844_v28, %v843_v27 }
 0x2a4   : > { %2168 = vmatpush3.bf16.msra.mxu0 %v2167_v31  ;;  %v846_v31 = vld [vmem:[#allocation5 + $0x2f8] sm:$0xff] }
 0x2a5   : > { %2169 = vmatprep.subr.bf16.mxu0 %v2548_v0  ;;  %v2197_v32 = vpack.c.bf16 %v846_v31, %v845_v30 }
 0x2a8   : > { %2171 = vmatpush3.bf16.msra.mxu0 %v2170_v34 }
 0x2a9   : > { %2172 = vmatprep.subr.bf16.mxu0 %v2548_v0 }
 0x2ac   : > { %2174 = vmatpush3.bf16.msra.mxu0 %v2173_v37 }
 0x2ad   : > { %2199 = vmatprep.subr.bf16.mxu0 %v2548_v0 }
 0x362   : > { %v544_v43 = vpop.f32.mrb[2].mxu0 }
 0x363   : > { %v550_v44 = vrot.slane %v544_v43, 4  ;;  %v556_v45 = vmul.f32 %v544_v43, %v544_v43  ;;  %v1809_v46 = vpop.f32.mrb[3].mxu0 }
 0x365   : > { %v551_v47 = vadd.f32 %v550_v44, %v544_v43  ;;  %v557_v48 = vrot.slane %v556_v45, 4 }
 0x367   : > { %v552_v49 = vrot.slane %v551_v47, 2  ;;  %v558_v50 = vadd.f32 %v557_v48, %v556_v45 }
 0x369   : > { %v553_v51 = vadd.f32 %v552_v49, %v551_v47  ;;  %v559_v52 = vrot.slane %v558_v50, 2 }
 0x36b   : > { %v554_v53 = vrot.slane %v553_v51, 1  ;;  %v560_v54 = vadd.f32 %v559_v52, %v558_v50 }
 0x36d   : > { %v555_v55 = vadd.f32 %v554_v53, %v553_v51  ;;  %v561_v56 = vrot.slane %v560_v54, 1 }
 0x36f   : > { %v562_v57 = vadd.f32 %v561_v56, %v560_v54  ;;  %v563_v58 = vmul.f32 0.125, %v555_v55 }
 0x371   : > { %v564_v59 = vmul.f32 0.125, %v562_v57  ;;  %v565_v60 = vmul.f32 %v563_v58, %v563_v58 }
 0x373   : > { %v566_v61 = vsub.f32 %v564_v59, %v565_v60  ;;  %v671_v59 = vld [vmem:[#allocation7 + $0x3] sm:$0x1] }
 0x375   : > { %v567_v62 = vmax.f32 %v566_v61, 0.0 }
 0x377   : > { %v568_v63 = vadd.f32 1e-05, %v567_v62  ;;  %v672_v62 = vld [vmem:[#allocation7 + $0xd] sm:$0x1] }
 0x379   : > { %2371 = vrsqrt.f32 %v568_v63 }
 0x383   : > { %v2372_v3 = vpop.eup %2371 }
 0x384   : > { %v570_v4 = vmul.f32 %v2372_v3, %v548_v2 }
 0x386   : > { %v571_v6 = vmul.f32 %v570_v4, %v563_v58  ;;  %v576_v7 = vrot.slane %v570_v4, %v2774_v13 }
 0x388   : > { %v572_v8 = vsub.f32 %v549_v5, %v571_v6  ;;  %v577_v9 = vmul.f32 %v576_v7, %v544_v43 }
 0x38a   : > { %v581_v10 = vrot.slane %v572_v8, %v2774_v13  ;;  %v831_v8 = vld [vmem:[#allocation5 + $0x280] sm:$0xff] }
 0x38c   : > { %v582_v11 = vadd.f32 %v581_v10, %v577_v9  ;;  %v832_v9 = vld [vmem:[#allocation5 + $0x288] sm:$0xff] }
 0x38d   : > { %v2176_v10 = vpack.c.bf16 %v832_v9, %v831_v8  ;;  %v958_v9 = vld [vmem:[#allocation5 + $0x320] sm:$0xff] }
 0x38e   : > { %v583_v12 = vmax.f32 %v582_v11, 0.0  ;;  %v833_v11 = vld [vmem:[#allocation5 + $0x290] sm:$0xff] }
 0x390   : > { %1843 = vmatmul.mubr.f32.vlgmr.msra.gmra.mrb[2].mxu1 %v583_v12  ;;  %v834_v12 = vld [vmem:[#allocation5 + $0x298] sm:$0xff] }
 0x391   : > { %1912 = vmatprep.mubr.msk.f32.mxu1 %vm2549_vm0, %v2550_v1  ;;  %2177 = vmatpush3.bf16.msra.mxu1 %v2176_v10  ;;  %v2179_v14 = vpack.c.bf16 %v834_v12, %v833_v11  ;;  %v959_v10 = vld [vmem:[#allocation5 + $0x328] sm:$0xff]  ;;  %v960_v12 = vld [vmem:[#allocation5 + $0x330] sm:$0xff] }
 0x392   : > { %2178 = vmatprep.subr.bf16.mxu1 %v2548_v0  ;;  %v2206_v11 = vpack.c.bf16 %v959_v10, %v958_v9  ;;  %v1085_v10 = vld [vmem:[#allocation5 + $0x3c0] sm:$0xff] }
 0x395   : > { %2180 = vmatpush3.bf16.msra.mxu1 %v2179_v14  ;;  %v961_v14 = vld [vmem:[#allocation5 + $0x338] sm:$0xff] }
 0x396   : > { %2181 = vmatprep.subr.bf16.mxu1 %v2548_v0  ;;  %v2209_v15 = vpack.c.bf16 %v961_v14, %v960_v12  ;;  %v1087_v14 = vld [vmem:[#allocation5 + $0x3d0] sm:$0xff] }
 0x399   : > { %2183 = vmatpush3.bf16.msra.mxu1 %v2182_v17  ;;  %v963_v17 = vld [vmem:[#allocation5 + $0x348] sm:$0xff] }
 0x39a   : > { %2184 = vmatprep.subr.bf16.mxu1 %v2548_v0  ;;  %v2212_v18 = vpack.c.bf16 %v963_v17, %v962_v16  ;;  %v1089_v17 = vld [vmem:[#allocation5 + $0x3e0] sm:$0xff] }
 0x39d   : > { %2186 = vmatpush3.bf16.msra.mxu1 %v2185_v20  ;;  %v965_v20 = vld [vmem:[#allocation5 + $0x358] sm:$0xff] }
 0x39e   : > { %2187 = vmatprep.subr.bf16.mxu1 %v2548_v0  ;;  %v2215_v21 = vpack.c.bf16 %v965_v20, %v964_v19  ;;  %v1091_v20 = vld [vmem:[#allocation5 + $0x3f0] sm:$0xff] }
 0x3a1   : > { %2189 = vmatpush3.bf16.msra.mxu1 %v2188_v23  ;;  %v967_v23 = vld [vmem:[#allocation5 + $0x368] sm:$0xff] }
 0x3a2   : > { %2190 = vmatprep.subr.bf16.mxu1 %v2548_v0  ;;  %v2218_v24 = vpack.c.bf16 %v967_v23, %v966_v22 }
 0x3a5   : > { %2192 = vmatpush3.bf16.msra.mxu1 %v2191_v26  ;;  %v969_v26 = vld [vmem:[#allocation5 + $0x378] sm:$0xff] }
 0x3a6   : > { %2193 = vmatprep.subr.bf16.mxu1 %v2548_v0  ;;  %v2221_v27 = vpack.c.bf16 %v969_v26, %v968_v25 }
 0x3a9   : > { %2195 = vmatpush3.bf16.msra.mxu1 %v2194_v29 }
 0x3aa   : > { %2196 = vmatprep.subr.bf16.mxu1 %v2548_v0 }
 0x3ad   : > { %2198 = vmatpush3.bf16.msra.mxu1 %v2197_v32 }
 0x3ae   : > { %2223 = vmatprep.subr.bf16.mxu1 %v2548_v0 }
 0x463   : > { %v667_v38 = vpop.f32.mrb[2].mxu1 }
 0x464   : > { %v673_v39 = vrot.slane %v667_v38, 4  ;;  %v679_v40 = vmul.f32 %v667_v38, %v667_v38  ;;  %v1844_v41 = vpop.f32.mrb[3].mxu1 }
 0x466   : > { %v674_v42 = vadd.f32 %v673_v39, %v667_v38  ;;  %v680_v43 = vrot.slane %v679_v40, 4 }
 0x468   : > { %v675_v44 = vrot.slane %v674_v42, 2  ;;  %v681_v45 = vadd.f32 %v680_v43, %v679_v40 }
 0x46a   : > { %v676_v46 = vadd.f32 %v675_v44, %v674_v42  ;;  %v682_v47 = vrot.slane %v681_v45, 2 }
 0x46c   : > { %v677_v48 = vrot.slane %v676_v46, 1  ;;  %v683_v49 = vadd.f32 %v682_v47, %v681_v45 }
 0x46e   : > { %v678_v50 = vadd.f32 %v677_v48, %v676_v46  ;;  %v684_v51 = vrot.slane %v683_v49, 1 }
 0x470   : > { %v685_v52 = vadd.f32 %v684_v51, %v683_v49  ;;  %v686_v53 = vmul.f32 0.125, %v678_v50 }
 0x472   : > { %v687_v54 = vmul.f32 0.125, %v685_v52  ;;  %v688_v55 = vmul.f32 %v686_v53, %v686_v53 }
 0x474   : > { %v689_v56 = vsub.f32 %v687_v54, %v688_v55  ;;  %v794_v54 = vld [vmem:[#allocation7 + $0x4] sm:$0x1] }
 0x476   : > { %v690_v57 = vmax.f32 %v689_v56, 0.0 }
 0x478   : > { %v691_v58 = vadd.f32 1e-05, %v690_v57  ;;  %v795_v57 = vld [vmem:[#allocation7 + $0xe] sm:$0x1] }
 0x47a   : > { %2373 = vrsqrt.f32 %v691_v58 }
 0x484   : > { %v2374_v60 = vpop.eup %2373 }
 0x485   : > { %v693_v61 = vmul.f32 %v2374_v60, %v671_v59 }
 0x487   : > { %v694_v63 = vmul.f32 %v693_v61, %v686_v53  ;;  %v699_v2 = vrot.slane %v693_v61, %v2774_v13 }
 0x489   : > { %v695_v3 = vsub.f32 %v672_v62, %v694_v63  ;;  %v700_v4 = vmul.f32 %v699_v2, %v667_v38 }
 0x48b   : > { %v704_v5 = vrot.slane %v695_v3, %v2774_v13  ;;  %v954_v3 = vld [vmem:[#allocation5 + $0x300] sm:$0xff] }
 0x48d   : > { %v705_v6 = vadd.f32 %v704_v5, %v700_v4  ;;  %v955_v4 = vld [vmem:[#allocation5 + $0x308] sm:$0xff] }
 0x48e   : > { %v2200_v5 = vpack.c.bf16 %v955_v4, %v954_v3  ;;  %v1081_v4 = vld [vmem:[#allocation5 + $0x3a0] sm:$0xff] }
 0x48f   : > { %v706_v7 = vmax.f32 %v705_v6, 0.0  ;;  %v956_v6 = vld [vmem:[#allocation5 + $0x310] sm:$0xff] }
 0x491   : > { %1878 = vmatmul.mubr.f32.vlgmr.msra.gmra.mrb[4].mxu0 %v706_v7  ;;  %v957_v7 = vld [vmem:[#allocation5 + $0x318] sm:$0xff] }
 0x492   : > { %1947 = vmatprep.mubr.msk.f32.mxu0 %vm2549_vm0, %v2550_v1  ;;  %2201 = vmatpush3.bf16.msra.mxu0 %v2200_v5  ;;  %v2203_v8 = vpack.c.bf16 %v957_v7, %v956_v6  ;;  %v1082_v5 = vld [vmem:[#allocation5 + $0x3a8] sm:$0xff]  ;;  %v1083_v7 = vld [vmem:[#allocation5 + $0x3b0] sm:$0xff] }
 0x493   : > { %2202 = vmatprep.subr.bf16.mxu0 %v2548_v0  ;;  %v2230_v6 = vpack.c.bf16 %v1082_v5, %v1081_v4  ;;  %v1208_v4 = vld [vmem:[#allocation5 + $0x440] sm:$0xff]  ;;  %v1209_v5 = vld [vmem:[#allocation5 + $0x448] sm:$0xff] }
 0x496   : > { %2204 = vmatpush3.bf16.msra.mxu0 %v2203_v8  ;;  %v1084_v8 = vld [vmem:[#allocation5 + $0x3b8] sm:$0xff] }
 0x497   : > { %2205 = vmatprep.subr.bf16.mxu0 %v2548_v0  ;;  %v2233_v9 = vpack.c.bf16 %v1084_v8, %v1083_v7  ;;  %v1210_v7 = vld [vmem:[#allocation5 + $0x450] sm:$0xff]  ;;  %v1211_v8 = vld [vmem:[#allocation5 + $0x458] sm:$0xff] }
 0x49a   : > { %2207 = vmatpush3.bf16.msra.mxu0 %v2206_v11  ;;  %v1086_v11 = vld [vmem:[#allocation5 + $0x3c8] sm:$0xff] }
 0x49b   : > { %2208 = vmatprep.subr.bf16.mxu0 %v2548_v0  ;;  %v2236_v12 = vpack.c.bf16 %v1086_v11, %v1085_v10  ;;  %v1212_v10 = vld [vmem:[#allocation5 + $0x460] sm:$0xff]  ;;  %v1213_v11 = vld [vmem:[#allocation5 + $0x468] sm:$0xff] }
 0x49e   : > { %2210 = vmatpush3.bf16.msra.mxu0 %v2209_v15  ;;  %v1088_v15 = vld [vmem:[#allocation5 + $0x3d8] sm:$0xff] }
 0x49f   : > { %2211 = vmatprep.subr.bf16.mxu0 %v2548_v0  ;;  %v2239_v16 = vpack.c.bf16 %v1088_v15, %v1087_v14  ;;  %v1214_v14 = vld [vmem:[#allocation5 + $0x470] sm:$0xff]  ;;  %v1215_v15 = vld [vmem:[#allocation5 + $0x478] sm:$0xff] }
 0x4a2   : > { %2213 = vmatpush3.bf16.msra.mxu0 %v2212_v18  ;;  %v1090_v18 = vld [vmem:[#allocation5 + $0x3e8] sm:$0xff] }
 0x4a3   : > { %2214 = vmatprep.subr.bf16.mxu0 %v2548_v0  ;;  %v2242_v19 = vpack.c.bf16 %v1090_v18, %v1089_v17 }
 0x4a6   : > { %2216 = vmatpush3.bf16.msra.mxu0 %v2215_v21  ;;  %v1092_v21 = vld [vmem:[#allocation5 + $0x3f8] sm:$0xff] }
 0x4a7   : > { %2217 = vmatprep.subr.bf16.mxu0 %v2548_v0  ;;  %v2245_v22 = vpack.c.bf16 %v1092_v21, %v1091_v20 }
 0x4aa   : > { %2219 = vmatpush3.bf16.msra.mxu0 %v2218_v24 }
 0x4ab   : > { %2220 = vmatprep.subr.bf16.mxu0 %v2548_v0 }
 0x4ae   : > { %2222 = vmatpush3.bf16.msra.mxu0 %v2221_v27 }
 0x4af   : > { %2247 = vmatprep.subr.bf16.mxu0 %v2548_v0 }
 0x564   : > { %v790_v33 = vpop.f32.mrb[4].mxu0 }
 0x565   : > { %v796_v34 = vrot.slane %v790_v33, 4  ;;  %v802_v35 = vmul.f32 %v790_v33, %v790_v33  ;;  %v1879_v36 = vpop.f32.mrb[5].mxu0 }
 0x567   : > { %v797_v37 = vadd.f32 %v796_v34, %v790_v33  ;;  %v803_v38 = vrot.slane %v802_v35, 4 }
 0x569   : > { %v798_v39 = vrot.slane %v797_v37, 2  ;;  %v804_v40 = vadd.f32 %v803_v38, %v802_v35 }
 0x56b   : > { %v799_v41 = vadd.f32 %v798_v39, %v797_v37  ;;  %v805_v42 = vrot.slane %v804_v40, 2 }
 0x56d   : > { %v800_v43 = vrot.slane %v799_v41, 1  ;;  %v806_v44 = vadd.f32 %v805_v42, %v804_v40 }
 0x56f   : > { %v801_v45 = vadd.f32 %v800_v43, %v799_v41  ;;  %v807_v46 = vrot.slane %v806_v44, 1 }
 0x571   : > { %v808_v47 = vadd.f32 %v807_v46, %v806_v44  ;;  %v809_v48 = vmul.f32 0.125, %v801_v45 }
 0x573   : > { %v810_v49 = vmul.f32 0.125, %v808_v47  ;;  %v811_v50 = vmul.f32 %v809_v48, %v809_v48 }
 0x575   : > { %v812_v51 = vsub.f32 %v810_v49, %v811_v50  ;;  %v917_v49 = vld [vmem:[#allocation7 + $0x5] sm:$0x1] }
 0x577   : > { %v813_v52 = vmax.f32 %v812_v51, 0.0 }
 0x579   : > { %v814_v53 = vadd.f32 1e-05, %v813_v52  ;;  %v918_v52 = vld [vmem:[#allocation7 + $0xf] sm:$0x1] }
 0x57b   : > { %2375 = vrsqrt.f32 %v814_v53 }
 0x585   : > { %v2376_v55 = vpop.eup %2375 }
 0x586   : > { %v816_v56 = vmul.f32 %v2376_v55, %v794_v54 }
 0x588   : > { %v817_v58 = vmul.f32 %v816_v56, %v809_v48  ;;  %v822_v59 = vrot.slane %v816_v56, %v2774_v13 }
 0x58a   : > { %v818_v60 = vsub.f32 %v795_v57, %v817_v58  ;;  %v823_v61 = vmul.f32 %v822_v59, %v790_v33 }
 0x58c   : > { %v827_v62 = vrot.slane %v818_v60, %v2774_v13  ;;  %v1077_v60 = vld [vmem:[#allocation5 + $0x380] sm:$0xff] }
 0x58e   : > { %v828_v63 = vadd.f32 %v827_v62, %v823_v61  ;;  %v1078_v61 = vld [vmem:[#allocation5 + $0x388] sm:$0xff] }
 0x58f   : > { %v2224_v62 = vpack.c.bf16 %v1078_v61, %v1077_v60  ;;  %v1204_v61 = vld [vmem:[#allocation5 + $0x420] sm:$0xff] }
 0x590   : > { %v829_v2 = vmax.f32 %v828_v63, 0.0  ;;  %v1079_v63 = vld [vmem:[#allocation5 + $0x390] sm:$0xff] }
 0x592   : > { %1913 = vmatmul.mubr.f32.vlgmr.msra.gmra.mrb[4].mxu1 %v829_v2  ;;  %v1080_v2 = vld [vmem:[#allocation5 + $0x398] sm:$0xff] }
 0x593   : > { %1982 = vmatprep.mubr.msk.f32.mxu1 %vm2549_vm0, %v2550_v1  ;;  %2225 = vmatpush3.bf16.msra.mxu1 %v2224_v62  ;;  %v2227_v3 = vpack.c.bf16 %v1080_v2, %v1079_v63  ;;  %v1205_v62 = vld [vmem:[#allocation5 + $0x428] sm:$0xff]  ;;  %v1206_v2 = vld [vmem:[#allocation5 + $0x430] sm:$0xff] }
 0x594   : > { %2226 = vmatprep.subr.bf16.mxu1 %v2548_v0  ;;  %v2254_v63 = vpack.c.bf16 %v1205_v62, %v1204_v61  ;;  %v1331_v61 = vld [vmem:[#allocation5 + $0x4c0] sm:$0xff]  ;;  %v1332_v62 = vld [vmem:[#allocation5 + $0x4c8] sm:$0xff] }
 0x597   : > { %2228 = vmatpush3.bf16.msra.mxu1 %v2227_v3 }
 0x598   : > { %2229 = vmatprep.subr.bf16.mxu1 %v2548_v0 }
 0x59b   : > { %2231 = vmatpush3.bf16.msra.mxu1 %v2230_v6  ;;  %v2260_v6 = vpack.c.bf16 %v1209_v5, %v1208_v4  ;;  %v1335_v4 = vld [vmem:[#allocation5 + $0x4e0] sm:$0xff]  ;;  %v1336_v5 = vld [vmem:[#allocation5 + $0x4e8] sm:$0xff] }
 0x59c   : > { %2232 = vmatprep.subr.bf16.mxu1 %v2548_v0 }
 0x59f   : > { %2234 = vmatpush3.bf16.msra.mxu1 %v2233_v9  ;;  %v2263_v9 = vpack.c.bf16 %v1211_v8, %v1210_v7  ;;  %v1337_v7 = vld [vmem:[#allocation5 + $0x4f0] sm:$0xff]  ;;  %v1338_v8 = vld [vmem:[#allocation5 + $0x4f8] sm:$0xff] }
 0x5a0   : > { %2235 = vmatprep.subr.bf16.mxu1 %v2548_v0 }
 0x5a3   : > { %2237 = vmatpush3.bf16.msra.mxu1 %v2236_v12  ;;  %v2266_v12 = vpack.c.bf16 %v1213_v11, %v1212_v10 }
 0x5a4   : > { %2238 = vmatprep.subr.bf16.mxu1 %v2548_v0 }
 0x5a7   : > { %2240 = vmatpush3.bf16.msra.mxu1 %v2239_v16  ;;  %v2269_v16 = vpack.c.bf16 %v1215_v15, %v1214_v14 }
 0x5a8   : > { %2241 = vmatprep.subr.bf16.mxu1 %v2548_v0 }
 0x5ab   : > { %2243 = vmatpush3.bf16.msra.mxu1 %v2242_v19 }
 0x5ac   : > { %2244 = vmatprep.subr.bf16.mxu1 %v2548_v0 }
 0x5af   : > { %2246 = vmatpush3.bf16.msra.mxu1 %v2245_v22 }
 0x5b0   : > { %2271 = vmatprep.subr.bf16.mxu1 %v2548_v0 }
 0x665   : > { %v913_v28 = vpop.f32.mrb[4].mxu1 }
 0x666   : > { %v919_v29 = vrot.slane %v913_v28, 4  ;;  %v925_v30 = vmul.f32 %v913_v28, %v913_v28  ;;  %v1914_v31 = vpop.f32.mrb[5].mxu1 }
 0x668   : > { %v920_v32 = vadd.f32 %v919_v29, %v913_v28  ;;  %v926_v33 = vrot.slane %v925_v30, 4 }
 0x66a   : > { %v921_v34 = vrot.slane %v920_v32, 2  ;;  %v927_v35 = vadd.f32 %v926_v33, %v925_v30 }
 0x66c   : > { %v922_v36 = vadd.f32 %v921_v34, %v920_v32  ;;  %v928_v37 = vrot.slane %v927_v35, 2 }
 0x66e   : > { %v923_v38 = vrot.slane %v922_v36, 1  ;;  %v929_v39 = vadd.f32 %v928_v37, %v927_v35 }
 0x670   : > { %v924_v40 = vadd.f32 %v923_v38, %v922_v36  ;;  %v930_v41 = vrot.slane %v929_v39, 1 }
 0x672   : > { %v931_v42 = vadd.f32 %v930_v41, %v929_v39  ;;  %v932_v43 = vmul.f32 0.125, %v924_v40 }
 0x674   : > { %v933_v44 = vmul.f32 0.125, %v931_v42  ;;  %v934_v45 = vmul.f32 %v932_v43, %v932_v43 }
 0x676   : > { %v935_v46 = vsub.f32 %v933_v44, %v934_v45  ;;  %v1040_v44 = vld [vmem:[#allocation7 + $0x6] sm:$0x1] }
 0x678   : > { %v936_v47 = vmax.f32 %v935_v46, 0.0 }
 0x67a   : > { %v937_v48 = vadd.f32 1e-05, %v936_v47  ;;  %v1041_v47 = vld [vmem:[#allocation7 + $0x10] sm:$0x1] }
 0x67c   : > { %2377 = vrsqrt.f32 %v937_v48 }
 0x686   : > { %v2378_v50 = vpop.eup %2377 }
 0x687   : > { %v939_v51 = vmul.f32 %v2378_v50, %v917_v49 }
 0x689   : > { %v940_v53 = vmul.f32 %v939_v51, %v932_v43  ;;  %v945_v54 = vrot.slane %v939_v51, %v2774_v13 }
 0x68b   : > { %v941_v55 = vsub.f32 %v918_v52, %v940_v53  ;;  %v946_v56 = vmul.f32 %v945_v54, %v913_v28 }
 0x68d   : > { %v950_v57 = vrot.slane %v941_v55, %v2774_v13  ;;  %v1200_v55 = vld [vmem:[#allocation5 + $0x400] sm:$0xff] }
 0x68f   : > { %v951_v58 = vadd.f32 %v950_v57, %v946_v56  ;;  %v1201_v56 = vld [vmem:[#allocation5 + $0x408] sm:$0xff] }
 0x690   : > { %v2248_v57 = vpack.c.bf16 %v1201_v56, %v1200_v55  ;;  %v1327_v55 = vld [vmem:[#allocation5 + $0x4a0] sm:$0xff]  ;;  %v1328_v56 = vld [vmem:[#allocation5 + $0x4a8] sm:$0xff] }
 0x691   : > { %v952_v59 = vmax.f32 %v951_v58, 0.0  ;;  %v1202_v58 = vld [vmem:[#allocation5 + $0x410] sm:$0xff] }
 0x693   : > { %1948 = vmatmul.mubr.f32.vlgmr.msra.gmra.mrb[6].mxu0 %v952_v59  ;;  %v1203_v59 = vld [vmem:[#allocation5 + $0x418] sm:$0xff] }
 0x694   : > { %2017 = vmatprep.mubr.msk.f32.mxu0 %vm2549_vm0, %v2550_v1  ;;  %2249 = vmatpush3.bf16.msra.mxu0 %v2248_v57  ;;  %v2251_v60 = vpack.c.bf16 %v1203_v59, %v1202_v58  ;;  %v2278_v57 = vpack.c.bf16 %v1328_v56, %v1327_v55  ;;  %v1329_v58 = vld [vmem:[#allocation5 + $0x4b0] sm:$0xff]  ;;  %v1330_v59 = vld [vmem:[#allocation5 + $0x4b8] sm:$0xff] }
 0x695   : > { %2250 = vmatprep.subr.bf16.mxu0 %v2548_v0 }
 0x698   : > { %2252 = vmatpush3.bf16.msra.mxu0 %v2251_v60  ;;  %v2281_v60 = vpack.c.bf16 %v1330_v59, %v1329_v58 }
 0x699   : > { %2253 = vmatprep.subr.bf16.mxu0 %v2548_v0 }
 0x69c   : > { %2255 = vmatpush3.bf16.msra.mxu0 %v2254_v63  ;;  %v2284_v63 = vpack.c.bf16 %v1332_v62, %v1331_v61 }
 0x69d   : > { %2256 = vmatprep.subr.bf16.mxu0 %v2548_v0 }
 0x766   : > { %v1036_v23 = vpop.f32.mrb[6].mxu0 }
 0x767   : > { %v1042_v24 = vrot.slane %v1036_v23, 4  ;;  %v1048_v25 = vmul.f32 %v1036_v23, %v1036_v23  ;;  %v1949_v26 = vpop.f32.mrb[7].mxu0 }
 0x769   : > { %v1043_v27 = vadd.f32 %v1042_v24, %v1036_v23  ;;  %v1049_v28 = vrot.slane %v1048_v25, 4 }
 0x76b   : > { %v1044_v29 = vrot.slane %v1043_v27, 2  ;;  %v1050_v30 = vadd.f32 %v1049_v28, %v1048_v25 }
 0x76d   : > { %v1045_v31 = vadd.f32 %v1044_v29, %v1043_v27  ;;  %v1051_v32 = vrot.slane %v1050_v30, 2 }
 0x76f   : > { %v1046_v33 = vrot.slane %v1045_v31, 1  ;;  %v1052_v34 = vadd.f32 %v1051_v32, %v1050_v30 }
 0x771   : > { %v1047_v35 = vadd.f32 %v1046_v33, %v1045_v31  ;;  %v1053_v36 = vrot.slane %v1052_v34, 1 }
 0x773   : > { %v1054_v37 = vadd.f32 %v1053_v36, %v1052_v34  ;;  %v1055_v38 = vmul.f32 0.125, %v1047_v35 }
 0x775   : > { %v1056_v39 = vmul.f32 0.125, %v1054_v37  ;;  %v1057_v40 = vmul.f32 %v1055_v38, %v1055_v38 }
 0x777   : > { %v1058_v41 = vsub.f32 %v1056_v39, %v1057_v40 }
 0x779   : > { %v1059_v42 = vmax.f32 %v1058_v41, 0.0  ;;  %v1164_v41 = vld [vmem:[#allocation7 + $0x11] sm:$0x1] }
 0x77b   : > { %v1060_v43 = vadd.f32 1e-05, %v1059_v42 }
 0x77d   : > { %2379 = vrsqrt.f32 %v1060_v43 }
 0x787   : > { %v2380_v45 = vpop.eup %2379 }
 0x788   : > { %v1062_v46 = vmul.f32 %v2380_v45, %v1040_v44 }
 0x78a   : > { %v1063_v48 = vmul.f32 %v1062_v46, %v1055_v38  ;;  %v1068_v49 = vrot.slane %v1062_v46, %v2774_v13  ;;  %v1163_v38 = vld [vmem:[#allocation7 + $0x7] sm:$0x1] }
 0x78c   : > { %v1064_v50 = vsub.f32 %v1041_v47, %v1063_v48  ;;  %v1069_v51 = vmul.f32 %v1068_v49, %v1036_v23  ;;  %v1323_v49 = vld [vmem:[#allocation5 + $0x480] sm:$0xff] }
 0x78e   : > { %v1073_v52 = vrot.slane %v1064_v50, %v2774_v13  ;;  %v1324_v50 = vld [vmem:[#allocation5 + $0x488] sm:$0xff] }
 0x790   : > { %v1074_v53 = vadd.f32 %v1073_v52, %v1069_v51  ;;  %v2272_v51 = vpack.c.bf16 %v1324_v50, %v1323_v49  ;;  %v1325_v52 = vld [vmem:[#allocation5 + $0x490] sm:$0xff] }
 0x792   : > { %v1075_v54 = vmax.f32 %v1074_v53, 0.0  ;;  %v1326_v53 = vld [vmem:[#allocation5 + $0x498] sm:$0xff] }
 0x794   : > { %1983 = vmatmul.mubr.f32.vlgmr.msra.gmra.mrb[6].mxu1 %v1075_v54  ;;  %v2275_v54 = vpack.c.bf16 %v1326_v53, %v1325_v52 }
 0x795   : > { %2052 = vmatprep.mubr.msk.f32.mxu1 %vm2549_vm0, %v2550_v1  ;;  %v1207_v1 = vld [vmem:[#allocation5 + $0x438] sm:$0xff]  ;;  %2273 = vmatpush3.bf16.msra.mxu1 %v2272_v51 }
 0x796   : > { %v2257_v3 = vpack.c.bf16 %v1207_v1, %v1206_v2  ;;  %2274 = vmatprep.subr.bf16.mxu1 %v2548_v0  ;;  %v1333_v2 = vld [vmem:[#allocation5 + $0x4d0] sm:$0xff]  ;;  %v1334_v1 = vld [vmem:[#allocation5 + $0x4d8] sm:$0xff] }
 0x798   : > { %2258 = vmatpush3.bf16.msra.mxu0 %v2257_v3  ;;  %v2287_v3 = vpack.c.bf16 %v1334_v1, %v1333_v2 }
 0x799   : > { %2259 = vmatprep.subr.bf16.mxu0 %v2548_v0  ;;  %2276 = vmatpush3.bf16.msra.mxu1 %v2275_v54 }
 0x79a   : > { %2277 = vmatprep.subr.bf16.mxu1 %v2548_v0 }
 0x79c   : > { %2261 = vmatpush3.bf16.msra.mxu0 %v2260_v6  ;;  %v2290_v6 = vpack.c.bf16 %v1336_v5, %v1335_v4 }
 0x79d   : > { %2262 = vmatprep.subr.bf16.mxu0 %v2548_v0  ;;  %2279 = vmatpush3.bf16.msra.mxu1 %v2278_v57 }
 0x79e   : > { %2280 = vmatprep.subr.bf16.mxu1 %v2548_v0 }
 0x7a0   : > { %2264 = vmatpush3.bf16.msra.mxu0 %v2263_v9  ;;  %v2293_v9 = vpack.c.bf16 %v1338_v8, %v1337_v7 }
 0x7a1   : > { %2265 = vmatprep.subr.bf16.mxu0 %v2548_v0  ;;  %2282 = vmatpush3.bf16.msra.mxu1 %v2281_v60 }
 0x7a2   : > { %2283 = vmatprep.subr.bf16.mxu1 %v2548_v0 }
 0x7a4   : > { %2267 = vmatpush3.bf16.msra.mxu0 %v2266_v12 }
 0x7a5   : > { %2268 = vmatprep.subr.bf16.mxu0 %v2548_v0  ;;  %2285 = vmatpush3.bf16.msra.mxu1 %v2284_v63 }
 0x7a6   : > { %2286 = vmatprep.subr.bf16.mxu1 %v2548_v0 }
 0x7a8   : > { %2270 = vmatpush3.bf16.msra.mxu0 %v2269_v16 }
 0x7a9   : > { %2288 = vmatpush3.bf16.msra.mxu1 %v2287_v3 }
 0x7aa   : > { %2289 = vmatprep.subr.bf16.mxu1 %v2548_v0 }
 0x7ad   : > { %2291 = vmatpush3.bf16.msra.mxu1 %v2290_v6 }
 0x7ae   : > { %2292 = vmatprep.subr.bf16.mxu1 %v2548_v0 }
 0x7b1   : > { %2294 = vmatpush3.bf16.msra.mxu1 %v2293_v9 }
 0x867   : > { %v1159_v17 = vpop.f32.mrb[6].mxu1 }
 0x868   : > { %v1165_v18 = vrot.slane %v1159_v17, 4  ;;  %v1171_v19 = vmul.f32 %v1159_v17, %v1159_v17  ;;  %v1984_v20 = vpop.f32.mrb[7].mxu1 }
 0x86a   : > { %v1166_v21 = vadd.f32 %v1165_v18, %v1159_v17  ;;  %v1172_v22 = vrot.slane %v1171_v19, 4 }
 0x86c   : > { %v1167_v23 = vrot.slane %v1166_v21, 2  ;;  %v1173_v24 = vadd.f32 %v1172_v22, %v1171_v19 }
 0x86e   : > { %v1168_v25 = vadd.f32 %v1167_v23, %v1166_v21  ;;  %v1174_v26 = vrot.slane %v1173_v24, 2 }
 0x870   : > { %v1169_v27 = vrot.slane %v1168_v25, 1  ;;  %v1175_v28 = vadd.f32 %v1174_v26, %v1173_v24 }
 0x872   : > { %v1170_v29 = vadd.f32 %v1169_v27, %v1168_v25  ;;  %v1176_v30 = vrot.slane %v1175_v28, 1 }
 0x874   : > { %v1177_v31 = vadd.f32 %v1176_v30, %v1175_v28  ;;  %v1178_v32 = vmul.f32 0.125, %v1170_v29 }
 0x876   : > { %v1179_v33 = vmul.f32 0.125, %v1177_v31  ;;  %v1180_v34 = vmul.f32 %v1178_v32, %v1178_v32  ;;  %v1286_v31 = vld [vmem:[#allocation7 + $0x8] sm:$0x1] }
 0x878   : > { %v1181_v35 = vsub.f32 %v1179_v33, %v1180_v34  ;;  %v1287_v34 = vld [vmem:[#allocation7 + $0x12] sm:$0x1] }
 0x87a   : > { %v1182_v36 = vmax.f32 %v1181_v35, 0.0 }
 0x87c   : > { %v1183_v37 = vadd.f32 1e-05, %v1182_v36 }
 0x87e   : > { %2381 = vrsqrt.f32 %v1183_v37 }
 0x888   : > { %v2382_v39 = vpop.eup %2381 }
 0x889   : > { %v1185_v40 = vmul.f32 %v2382_v39, %v1163_v38 }
 0x88b   : > { %v1186_v42 = vmul.f32 %v1185_v40, %v1178_v32  ;;  %v1191_v43 = vrot.slane %v1185_v40, %v2774_v13 }
 0x88d   : > { %v1187_v44 = vsub.f32 %v1164_v41, %v1186_v42  ;;  %v1192_v45 = vmul.f32 %v1191_v43, %v1159_v17  ;;  %v1530_v42 = vld [vmem:[#allocation7 + $0x13] ss:$0 sm:$0xff] }
 0x88f   : > { %v1196_v46 = vrot.slane %v1187_v44, %v2774_v13 }
 0x891   : > { %v1197_v47 = vadd.f32 %v1196_v46, %v1192_v45 }
 0x893   : > { %v1198_v48 = vmax.f32 %v1197_v47, 0.0 }
 0x895   : > { %2018 = vmatmul.mubr.f32.vlgmr.msra.gmra.mrb[8].mxu0 %v1198_v48 }
 0x968   : > { %v1282_v10 = vpop.f32.mrb[8].mxu0 }
 0x969   : > { %v1288_v11 = vrot.slane %v1282_v10, 4  ;;  %v1294_v12 = vmul.f32 %v1282_v10, %v1282_v10  ;;  %v2019_v14 = vpop.f32.mrb[9].mxu0 }
 0x96b   : > { %v1289_v15 = vadd.f32 %v1288_v11, %v1282_v10  ;;  %v1295_v16 = vrot.slane %v1294_v12, 4 }
 0x96d   : > { %v1290_v17 = vrot.slane %v1289_v15, 2  ;;  %v1296_v18 = vadd.f32 %v1295_v16, %v1294_v12 }
 0x96f   : > { %v1291_v19 = vadd.f32 %v1290_v17, %v1289_v15  ;;  %v1297_v20 = vrot.slane %v1296_v18, 2 }
 0x971   : > { %v1292_v21 = vrot.slane %v1291_v19, 1  ;;  %v1298_v22 = vadd.f32 %v1297_v20, %v1296_v18 }
 0x973   : > { %v1293_v23 = vadd.f32 %v1292_v21, %v1291_v19  ;;  %v1299_v24 = vrot.slane %v1298_v22, 1 }
 0x975   : > { %v1300_v25 = vadd.f32 %v1299_v24, %v1298_v22  ;;  %v1301_v0 = vmul.f32 0.125, %v1293_v23 }
 0x977   : > { %v1302_v26 = vmul.f32 0.125, %v1300_v25  ;;  %v1303_v27 = vmul.f32 %v1301_v0, %v1301_v0 }
 0x979   : > { %v1304_v28 = vsub.f32 %v1302_v26, %v1303_v27 }
 0x97b   : > { %v1305_v29 = vmax.f32 %v1304_v28, 0.0 }
 0x97d   : > { %v1306_v30 = vadd.f32 1e-05, %v1305_v29 }
 0x97f   : > { %2383 = vrsqrt.f32 %v1306_v30 }
 0x989   : > { %v2384_v32 = vpop.eup %2383 }
 0x98a   : > { %v1308_v33 = vmul.f32 %v2384_v32, %v1286_v31 }
 0x98c   : > { %v1309_v35 = vmul.f32 %v1308_v33, %v1301_v0  ;;  %v1314_v36 = vrot.slane %v1308_v33, %v2774_v13 }
 0x98e   : > { %v1310_v37 = vsub.f32 %v1287_v34, %v1309_v35  ;;  %v1315_v38 = vmul.f32 %v1314_v36, %v1282_v10 }
 0x990   : > { %v1319_v39 = vrot.slane %v1310_v37, %v2774_v13 }
 0x992   : > { %v1320_v40 = vadd.f32 %v1319_v39, %v1315_v38 }
 0x994   : > { %v1321_v41 = vmax.f32 %v1320_v40, 0.0 }
 0x996   : > { %2053 = vmatmul.mubr.f32.vlgmr.msra.gmra.mrb[8].mxu1 %v1321_v41 }
 0xa69   : > { %v1410_v43 = vpop.f32.mrb[8].mxu1 }
 0xa6a   : > { %v1411_v44 = vadd.f32 %v1530_v42, %v1410_v43  ;;  %v2054_v45 = vpop.f32.mrb[9].mxu1 }
 0xa6c   : > { %1414 = vst [vmem:[%s214_s20] sm:$0xff] %v1411_v44 }
 0xa6d   : > { %2484 = shalt.err (!%p2481_p7)
}
 0xa6e   : > { %s2485_s10 = scalar_lea.hbm %s2876_s27, 128  ;;  %s2489_s7 = scalar_lea.hbm %s2922_s3, 512 }
 0xa6f   : > { %p2486_p9 = scmp.ne.s32.totalorder %s2876_s27, %s2485_s10  ;;  %p2490_p0 = scmp.lt.u32.totalorder %s2876_s27, %s2922_s3 }
 0xa70   : > { %p2491_p10 = scmp.lt.u32.totalorder %s2489_s7, %s2485_s10  ;;  %p2493_p1 = scmp.lt.u32.totalorder %s2485_s10, %s2876_s27 }
 0xa71   : > { %p2487_p12 = pnand %p2486_p9, %p2684_p4 }
 0xa72   : > { %p2492_p11 = por %p2491_p10, %p2490_p0 }
 0xa73   : > { %p2488_p5 = pneg %p2487_p12 }
 0xa74   : > { %p2494_p2 = por %p2493_p1, %p2492_p11 }
 0xa76   : > { %p2495_p6 = pnand %p2494_p2, %p2488_p5 }
 0xa78   : > { %2498 = shalt.err (!%p2495_p6)
}
 0xa79   : > { %2305 = dma.vmem_to_hbm [thread:$0]  (%p2684_p4), %s2878_s17, 128, %s2876_s27, %s1416_s29  }
 0xa7a PF: > { %p2327_p8 = scmp.ge.s32.totalorder %s2541_s15, 2  ;;  %s1441_s28 = sand.u32 1, %s2529_s12  }
 0xa7b   : > { %p2937_p13 = scmp.ne.s32.totalorder %s2927_s19, 0  ;;  %s1442_s22 = scalar_lea.sflag [#allocation4], %s1441_s28 }
 0xa7d   : > { %p2319_p3 = pnand %p2327_p8, %p2937_p13 }
 0xa7f   : > { %2524 = dma.done.wait (!%p2319_p3), %s1442_s22, 128  }
 0xa80   : > { %2526 = vsyncadd (!%p2319_p3), %s1442_s22, 4294967168  ;;  %p17_p7 = scmp.ge.s32.totalorder %s2674_s4, 6   ;;  %s2938_s12 = smov %s2533_s13 }
 0xa81   : > { %s2939_s13 = smov %s2537_s14  ;;  %s2940_s14 = smov %s2690_s9 }
 0xa82   : > { %s2941_s15 = smov %s2674_s4  ;;  %19 = sbr.rel (!%p17_p7) target bundleno = 6 (0x6), region = 94 }
 0xa89   :  { %1447 = vsyncpa [#allocation3], 1 }
 0xa8a   :  { %1449 = vsyncpa [#allocation3 + $0x1], 1 }
 0xa8b   :  { %1450 = vsyncpa [#allocation6], 1 }
 0xa8c   :  { %1451 = vsyncpa [#allocation4], 1 }
 0xa8d   :  { %1453 = vsyncpa [#allocation4 + $0x1], 1 }

</bundles_post_ra>
